<compile_context>
chip_gen: v5e
topology: v5e:2x2
jax: 0.10.0
libtpu: 0.0.40
codegen_flags: <defaults>
</compile_context>

<pallas_src>
import jax
import jax.numpy as jnp
from jax.experimental import pallas as pl
from jax.experimental.pallas import tpu as pltpu


_LANE = 128        # lane width: hidden dim padded to a multiple of this
_TILE_Q = 256      # MXU-sized tile quantum for the node dimension
_NEG_BIAS = -1e9   # pad-column bias value -> softplus(pad) == 0 exactly


def _round_up(v, m):
    return ((v + m - 1) // m) * m


# --------------------------------------------------------------------------
# Kernel: one (row-tile, K-tile) step of softplus(A_norm @ g + bias)
# --------------------------------------------------------------------------
def gcde_kernel(g_ref, a_ref, b_ref, o_ref, acc_ref):
    k = pl.program_id(1)

    @pl.when(k == 0)
    def _():
        acc_ref[...] = jnp.zeros_like(acc_ref)

    # (tm, tk) @ (tk, Hp) on the MXU, f32 accumulation.
    acc_ref[...] += jnp.dot(a_ref[...], g_ref[...],
                            preferred_element_type=jnp.float32)

    @pl.when(k == pl.num_programs(1) - 1)
    def _():
        h = acc_ref[...] + b_ref[...]                      # (1, Hp) broadcast
        o_ref[...] = jax.nn.softplus(h).astype(o_ref.dtype)  # EUP epilogue


# --------------------------------------------------------------------------
# One-time graph preparation (outside the ODE-solver loop)
# --------------------------------------------------------------------------
def prepare_graph(adj, *, dtype=jnp.bfloat16):
    """Fold D^-1/2 A D^-1/2 into the adjacency and zero-pad N to a tile multiple.

    Called once per graph. bf16 halves the HBM/VMEM traffic of the dominant
    (N, N) operand; pass jnp.float32 for a bit-exact path. (fp8 e4m3 on v7x /
    int8 on v6e would halve it again — validate accuracy first, the solver
    compounds RHS error.)

    Note: degree is clamped with max(deg, 1) so isolated nodes stay finite;
    the plain rsqrt(deg) reference produces inf/NaN for them. Identical when
    self-loops are present.
    """
    n = adj.shape[0]
    deg = jnp.sum(adj.astype(jnp.float32), axis=1, keepdims=True)
    norm = jax.lax.rsqrt(jnp.maximum(deg, 1.0))
    a = norm * adj.astype(jnp.float32) * norm.T
    n_pad = _round_up(n, _TILE_Q)
    if n_pad != n:
        a = jnp.pad(a, ((0, n_pad - n), (0, n_pad - n)))
    return a.astype(dtype)


# --------------------------------------------------------------------------
# VMEM / tile sizing helpers
# --------------------------------------------------------------------------
def _vmem_limit_bytes():
    """Per-core VMEM budget with headroom (v5e/v6e: 128 MiB, v7x: 64 MiB/TC)."""
    cap = 64 * 1024 * 1024  # conservative fallback (v7x per-TC)
    try:
        info = pltpu.get_tpu_info()
        cap = int(getattr(info, "vmem_capacity_bytes", cap) or cap)
    except Exception:
        pass
    return max(32 * 1024 * 1024, min(cap - 16 * 1024 * 1024, int(cap * 0.85)))


def _largest_tile(total, cap, quantum=_TILE_Q):
    """Largest multiple of `quantum` that divides `total` and is <= cap."""
    if total <= cap:
        return total
    best = quantum
    t = quantum
    while t <= cap:
        if total % t == 0:
            best = t
        t += quantum
    return best


# --------------------------------------------------------------------------
# Forward wrapper: GCDEFunc.forward(t, x)
# --------------------------------------------------------------------------
def gcde_func_forward(t, x, weight, a_norm, bias, *, tm=None, tk=None,
                      unpad=True, a_buffers=None):
    """Pallas implementation of GCDEFunc.forward(t, x).

    `t` is unused (as in the PyTorch module). `a_norm` is the pre-normalized,
    pre-padded adjacency from `prepare_graph`. With unpad=False the padded
    (N_pad, H_pad) output is returned (pad columns are exactly 0), so an ODE
    solver can keep the padded layout as its state and slice only once at the
    end of integration instead of copying the output every RHS evaluation.
    `a_buffers` optionally requests deeper pipelining (e.g. 3) on the streamed
    adjacency; sweep 2-4 when DMA latency is exposed.
    """
    del t
    n, _ = x.shape
    h = weight.shape[1]
    n_pad = a_norm.shape[0]
    assert a_norm.shape == (n_pad, n_pad), "a_norm must be square (prepare_graph)"
    assert n_pad >= n and n_pad % _TILE_Q == 0, "use prepare_graph() to pad A"

    # Lane-dense output / full MXU output lanes: pad hidden dim to 128.
    h_pad = _round_up(h, _LANE)
    if h_pad != h:
        weight = jnp.pad(weight, ((0, 0), (0, h_pad - h)))
        # Negative bias padding: softplus(pad) == 0 exactly, so padded output
        # columns are zero and safe to carry through the solver.
        bias = jnp.pad(bias, ((0, 0), (0, h_pad - h)), constant_values=_NEG_BIAS)
    bias = bias.astype(jnp.float32)

    # Hoisted projection: one small XLA matmul per RHS eval, cast once to the
    # streamed-adjacency dtype (bf16 path: single rounding of g), rows padded
    # to the padded graph size with zeros.
    g = jnp.dot(x, weight, preferred_element_type=jnp.float32).astype(a_norm.dtype)
    if n_pad != n:
        g = jnp.pad(g, ((0, n_pad - n), (0, 0)))

    a_item = jnp.dtype(a_norm.dtype).itemsize
    g_item = jnp.dtype(g.dtype).itemsize
    out_dtype = x.dtype
    out_item = jnp.dtype(out_dtype).itemsize

    vmem_limit = _vmem_limit_bytes()

    # ---- Tile sizing ------------------------------------------------------
    # Row tile: MXU-sized multiple of 256, capped at 1024 to bound acc/out.
    if tm is None:
        tm = _largest_tile(n_pad, min(n_pad, 1024))
    tm = int(tm)
    assert n_pad % tm == 0, "tm must divide the padded node count"

    # Fixed VMEM: f32 accumulator + double-buffered output + bias + margin.
    fixed = tm * h_pad * 4 + 2 * tm * h_pad * out_item + 2 * h_pad * 4
    fixed += 2 * 1024 * 1024                         # compiler-internal headroom
    remaining = max(vmem_limit - fixed, 8 * 1024 * 1024)

    # K tile: collapse to one K step when the full (tm, N_pad) A slab plus g
    # fit; otherwise stream (tm, tk) A / (tk, Hp) g tiles, double-buffered.
    if tk is None:
        full_k_bytes = 2 * tm * n_pad * a_item + 2 * n_pad * h_pad * g_item
        if full_k_bytes <= remaining:
            tk = n_pad
        else:
            per_k = 2 * (tm * a_item + h_pad * g_item)
            tk = _largest_tile(n_pad, max(remaining // per_k, _TILE_Q))
    tk = int(tk)
    assert n_pad % tk == 0, "tk must divide the padded node count"

    grid = (n_pad // tm, n_pad // tk)

    # Accurate cost hint (projection is no longer inside the kernel).
    g_reads = grid[0] if grid[1] > 1 else 1
    cost = pl.CostEstimate(
        flops=int(2 * n_pad * n_pad * h_pad),
        transcendentals=int(2 * n_pad * h_pad),
        bytes_accessed=int(
            a_norm.size * a_item
            + g.size * g_item * g_reads
            + bias.size * 4
            + n_pad * h_pad * out_item
        ),
    )

    a_spec_kwargs = {}
    if a_buffers is not None and a_buffers != 2:
        a_spec_kwargs["pipeline_mode"] = pl.Buffered(int(a_buffers))

    out = pl.pallas_call(
        gcde_kernel,
        out_shape=jax.ShapeDtypeStruct((n_pad, h_pad), out_dtype),
        grid_spec=pltpu.PrefetchScalarGridSpec(
            num_scalar_prefetch=0,
            grid=grid,
            in_specs=[
                pl.BlockSpec((tk, h_pad), lambda i, k: (k, 0)),     # g (projection)
                pl.BlockSpec((tm, tk), lambda i, k: (i, k),         # A_norm (streamed)
                             **a_spec_kwargs),
                pl.BlockSpec((1, h_pad), lambda i, k: (0, 0)),      # bias (resident)
            ],
            out_specs=pl.BlockSpec((tm, h_pad), lambda i, k: (i, 0)),
            scratch_shapes=[pltpu.VMEM((tm, h_pad), jnp.float32)],
        ),
        compiler_params=pltpu.CompilerParams(
            dimension_semantics=("parallel", "arbitrary"),
            vmem_limit_bytes=int(vmem_limit),
        ),
        cost_estimate=cost,
    )(g, a_norm, bias)

    if unpad:
        # One full-output copy; for ODE-solver loops prefer unpad=False and
        # slice once after integration (pad columns are exactly zero).
        return out[:n, :h]
    return out


# --------------------------------------------------------------------------
# Pure-JAX reference mirroring the PyTorch GCNLayer math (f32)
# --------------------------------------------------------------------------
def reference_forward(x, weight, adj, bias):
    deg = jnp.sum(adj, axis=1, keepdims=True)
    norm = jax.lax.rsqrt(deg)          # unclamped, like the PyTorch layer
    h = x @ weight
    h = h * norm
    h = adj @ h
    h = h * norm
    h = h + bias
    return jax.nn.softplus(h)


if __name__ == "__main__":
    key = jax.random.PRNGKey(0)
    k_x, k_w, k_a, k_b = jax.random.split(key, 4)

    N = 256          # graph nodes (== one MXU-sized tile -> grid (1, 1))
    INPUT_DIM = 16   # input feature dim
    HIDDEN_DIM = 32  # hidden feature dim (padded to 128 lanes in the wrapper)

    # Node features.
    x = jax.random.normal(k_x, (N, INPUT_DIM), dtype=jnp.float32)

    # Deterministic synthetic graph: random sparse-ish adjacency + self-loops.
    a_rand = jax.random.uniform(k_a, (N, N))
    adj = (a_rand < 0.2).astype(jnp.float32)
    adj = jnp.maximum(adj, adj.T)                           # symmetrize
    adj = jnp.maximum(adj, jnp.eye(N, dtype=jnp.float32))   # self-loops

    # GCNLayer parameters (deterministic synthetic init, no checkpoint).
    weight = jax.random.normal(k_w, (INPUT_DIM, HIDDEN_DIM), dtype=jnp.float32) * (
        1.0 / jnp.sqrt(jnp.float32(INPUT_DIM)))
    bias = jax.random.normal(k_b, (1, HIDDEN_DIM), dtype=jnp.float32) * 0.01

    t = jnp.float32(0.0)  # ODE time, unused by the layer (matches PyTorch forward)

    ref = reference_forward(x, weight, adj, bias)

    # --- Exact-structure check: f32 folded adjacency -----------------------
    a_f32 = prepare_graph(adj, dtype=jnp.float32)
    out_f32 = jax.block_until_ready(gcde_func_forward(t, x, weight, a_f32, bias))
    assert out_f32.shape == (N, HIDDEN_DIM)
    assert jnp.allclose(out_f32, ref, atol=1e-4, rtol=1e-4)

    # --- Production path: bf16-streamed adjacency (half the HBM traffic) ---
    a_bf16 = prepare_graph(adj, dtype=jnp.bfloat16)
    out = jax.block_until_ready(gcde_func_forward(t, x, weight, a_bf16, bias))
    assert out.shape == (N, HIDDEN_DIM)
    assert jnp.allclose(out, ref, atol=3e-2, rtol=3e-2)   # bf16-epsilon level error

    # --- Padded-state path (solver-friendly: no per-call unpad copy) -------
    out_pad = jax.block_until_ready(
        gcde_func_forward(t, x, weight, a_bf16, bias, unpad=False))
    assert out_pad.shape == (N, 128)
    assert jnp.allclose(out_pad[:, HIDDEN_DIM:], 0.0)      # pad columns exactly 0
    assert jnp.allclose(out_pad[:N, :HIDDEN_DIM], ref, atol=3e-2, rtol=3e-2)

    print("KERNEL_OK")
</pallas_src>

<mosaic_0001>
module attributes {stable_mosaic.version = 11 : i64} {
  func.func @gcde_kernel(%arg0: i32, %arg1: i32, %arg2: memref<256x128xf32, #tpu.memory_space<vmem>>, %arg3: memref<256x256xf32, #tpu.memory_space<vmem>>, %arg4: memref<1x128xf32, #tpu.memory_space<vmem>>, %arg5: memref<256x128xf32, #tpu.memory_space<vmem>>, %arg6: memref<256x128xf32, #tpu.memory_space<vmem>>) attributes {dimension_semantics = [#tpu.dimension_semantics<parallel>, #tpu.dimension_semantics<arbitrary>], iteration_bounds = array<i64: 1, 1>, scalar_prefetch = 0 : i64, scratch_operands = 1 : i64, tpu.core_type = #tpu.core_type<tc>, window_params = [{transform_indices = @transform_0, window_bounds = array<i64: 256, 128>}, {transform_indices = @transform_1, window_bounds = array<i64: 256, 256>}, {pipeline_mode = #tpu.pipeline_mode<synchronous>, transform_indices = @transform_2, window_bounds = array<i64: 1, 128>}, {transform_indices = @transform_3, window_bounds = array<i64: 256, 128>}]} {
    %c0_i32 = arith.constant 0 : i32
    %0 = arith.cmpi eq, %arg1, %c0_i32 : i32
    %1 = arith.extui %0 : i1 to i32
    %c0_i32_0 = arith.constant 0 : i32
    %2 = arith.cmpi ne, %1, %c0_i32_0 : i32
    scf.if %2 {
      %cst_10 = arith.constant 0.000000e+00 : f32
      %12 = vector.broadcast %cst_10 : f32 to vector<256x128xf32>
      %c0_11 = arith.constant 0 : index
      %c0_12 = arith.constant 0 : index
      %13 = vector.load %arg6[%c0_11, %c0_12] : memref<256x128xf32, #tpu.memory_space<vmem>>, vector<256x128xf32>
      tpu.vector_store %arg6[%c0_11, %c0_12], %12 {strides = array<i32>} : memref<256x128xf32, #tpu.memory_space<vmem>>, vector<256x128xf32>,
    } else {
    }
    %c0 = arith.constant 0 : index
    %c0_1 = arith.constant 0 : index
    %3 = vector.load %arg6[%c0, %c0_1] : memref<256x128xf32, #tpu.memory_space<vmem>>, vector<256x128xf32>
    %c0_2 = arith.constant 0 : index
    %c0_3 = arith.constant 0 : index
    %4 = vector.load %arg3[%c0_2, %c0_3] : memref<256x256xf32, #tpu.memory_space<vmem>>, vector<256x256xf32>
    %c0_4 = arith.constant 0 : index
    %c0_5 = arith.constant 0 : index
    %5 = vector.load %arg2[%c0_4, %c0_5] : memref<256x128xf32, #tpu.memory_space<vmem>>, vector<256x128xf32>
    %cst = arith.constant dense<0.000000e+00> : vector<256x128xf32>
    %6 = tpu.matmul %4, %5, %cst {dimension_numbers = #tpu.dot_dimension_numbers<[1], [0], [0], [1], [0, 0, 1, 1], [], []>} : vector<256x256xf32>, vector<256x128xf32>, vector<256x128xf32> -> vector<256x128xf32>
    %7 = arith.addf %3, %6 : vector<256x128xf32>
    %c0_6 = arith.constant 0 : index
    %c0_7 = arith.constant 0 : index
    %8 = vector.load %arg6[%c0_6, %c0_7] : memref<256x128xf32, #tpu.memory_space<vmem>>, vector<256x128xf32>
    tpu.vector_store %arg6[%c0_6, %c0_7], %7 {strides = array<i32>} : memref<256x128xf32, #tpu.memory_space<vmem>>, vector<256x128xf32>,
    %c0_i32_8 = arith.constant 0 : i32
    %9 = arith.cmpi eq, %arg1, %c0_i32_8 : i32
    %10 = arith.extui %9 : i1 to i32
    %c0_i32_9 = arith.constant 0 : i32
    %11 = arith.cmpi ne, %10, %c0_i32_9 : i32
    scf.if %11 {
      %c0_10 = arith.constant 0 : index
      %c0_11 = arith.constant 0 : index
      %12 = vector.load %arg6[%c0_10, %c0_11] : memref<256x128xf32, #tpu.memory_space<vmem>>, vector<256x128xf32>
      %c0_12 = arith.constant 0 : index
      %c0_13 = arith.constant 0 : index
      %13 = vector.load %arg4[%c0_12, %c0_13] : memref<1x128xf32, #tpu.memory_space<vmem>>, vector<1x128xf32>
      %14 = vector.broadcast %13 : vector<1x128xf32> to vector<256x128xf32>
      %15 = arith.addf %12, %14 : vector<256x128xf32>
      %cst_14 = arith.constant 0.000000e+00 : f32
      %16 = vector.broadcast %cst_14 : f32 to vector<256x128xf32>
      %17 = arith.maximumf %15, %16 : vector<256x128xf32>
      %18 = vector.broadcast %cst_14 : f32 to vector<256x128xf32>
      %19 = arith.subf %15, %18 : vector<256x128xf32>
      %20 = arith.cmpf one, %19, %19 : vector<256x128xf32>
      %21 = vector.broadcast %cst_14 : f32 to vector<256x128xf32>
      %22 = arith.addf %15, %21 : vector<256x128xf32>
      %23 = math.absf %19 : vector<256x128xf32>
      %cst_15 = arith.constant 0.000000e+00 : f32
      %24 = vector.broadcast %cst_15 : f32 to vector<256x128xf32>
      %25 = arith.subf %24, %23 : vector<256x128xf32>
      %26 = math.exp %25 : vector<256x128xf32>
      %27 = math.log1p %26 : vector<256x128xf32>
      %28 = arith.addf %17, %27 : vector<256x128xf32>
      %29 = arith.select %20, %22, %28 : vector<256x128xi1>, vector<256x128xf32>
      %c0_16 = arith.constant 0 : index
      %c0_17 = arith.constant 0 : index
      %30 = vector.load %arg5[%c0_16, %c0_17] : memref<256x128xf32, #tpu.memory_space<vmem>>, vector<256x128xf32>
      tpu.vector_store %arg5[%c0_16, %c0_17], %29 {strides = array<i32>} : memref<256x128xf32, #tpu.memory_space<vmem>>, vector<256x128xf32>,
    } else {
    }
    return
  }
  func.func @transform_0(%arg0: i32, %arg1: i32) -> (i32, i32) {
    %c0_i32 = arith.constant 0 : i32
    %c0_i32_0 = arith.constant 0 : i32
    return %arg1, %c0_i32 : i32, i32
  }
  func.func @transform_1(%arg0: i32, %arg1: i32) -> (i32, i32) {
    %c0_i32 = arith.constant 0 : i32
    return %arg0, %arg1 : i32, i32
  }
  func.func @transform_2(%arg0: i32, %arg1: i32) -> (i32, i32) {
    %c0_i32 = arith.constant 0 : i32
    %c0_i32_0 = arith.constant 0 : i32
    %c0_i32_1 = arith.constant 0 : i32
    return %c0_i32, %c0_i32_0 : i32, i32
  }
  func.func @transform_3(%arg0: i32, %arg1: i32) -> (i32, i32) {
    %c0_i32 = arith.constant 0 : i32
    %c0_i32_0 = arith.constant 0 : i32
    return %arg0, %c0_i32 : i32, i32
  }
}

</mosaic_0001>

<bundles_post_ra>
// kernel: tpu_custom_call.1
= control target key start
LH: loop header
LB: loop body
LE: loop exit
PB: predicated region body
PF: predicated region fallthrough
CT: control target
= control target key end

     0   :  { %8 = vsyncpa [#allocation4], 0  ;;  %s1897_s0 = inlined_call_operand.hbm [shape: f32[256,128], index: 0, kind: input, shape index: {}]   ;;  %s1898_s1 = inlined_call_operand.hbm [shape: f32[256,256], index: 1, kind: input, shape index: {}]   ;;  %s1899_s2 = inlined_call_operand.vmem [shape: f32[1,128], index: 2, kind: input, shape index: {}]   ;;  %s1900_s3 = inlined_call_operand.hbm [shape: f32[256,128], index: 3, kind: output, shape index: {}]  }
   0x1   :  { %9 = vsyncpa [#allocation7], 0 }
   0x2   :  { %10 = vsyncpa [#allocation5], 0  ;;  %s15_s14 = sshll.u32 %s1897_s0, 4  ;;  %s1447_s15 = smov [#allocation3]   ;;  %s16_s14 = int_to_ptr.hbm [resolvable:$true] %s15_s14 }
   0x3   :  { %s17_s16 = sshll.u32 %s1447_s15, 4  ;;  %s28_s19 = sshll.u32 %s1898_s1, 4  ;;  %s18_s16 = int_to_ptr.vmem [resolvable:$true] %s17_s16  ;;  %s29_s19 = int_to_ptr.hbm [resolvable:$true] %s28_s19 }
   0x4   :  { %s1448_s20 = smov 128   ;;  %s1449_s21 = smov 8  }
   0x5   :  { %23 = dma.hbm_to_vmem [thread:$0]  %s16_s14, 4096, %s18_s16, [#allocation4], %s1448_s20, %s1448_s20, %s1449_s21  }
   0x6   :  { %s1450_s22 = smov [#allocation6]   ;;  %s1451_s24 = smov 256  }
   0x7   :  { %s30_s23 = sshll.u32 %s1450_s22, 4  ;;  %s1452_s0 = smov 16   ;;  %s31_s23 = int_to_ptr.vmem [resolvable:$true] %s30_s23 }
   0x8   :  { %36 = dma.hbm_to_vmem [thread:$0]  %s29_s19, 8192, %s31_s23, [#allocation7], %s1451_s24, %s1451_s24, %s1452_s0  }
   0x9   :  { %1441 = dma.done.wait [#allocation4], 4096  }
   0xa   :  { %1442 = vsyncadd [#allocation4], 4294963200 }
   0xb   :  { %1443 = dma.done.wait [#allocation7], 8192  }
   0xc   :  { %1444 = vsyncadd [#allocation7], 4294959104  ;;  %v194_v0 = vld [vmem:[#allocation3 + $0x78] sm:$0xff]  ;;  %v193_v2 = vld [vmem:[#allocation3 + $0x70] sm:$0xff]  ;;  %s1186_s4 = sshll.u32 %s1900_s3, 4  ;;  %s1187_s4 = int_to_ptr.hbm [resolvable:$true] %s1186_s4 }
   0xd   :  { %v210_v1 = vld [vmem:[#allocation3 + $0xf8] sm:$0xff]  ;;  %211 = vmatpush.msra.mxu0 %v194_v0  ;;  %1200 = vmatpush.msra.mxu2 %v194_v0  ;;  %v209_v3 = vld [vmem:[#allocation3 + $0xf0] sm:$0xff]  ;;  %v192_v4 = vld [vmem:[#allocation3 + $0x68] sm:$0xff] }
   0xe   :  { %324 = vmatpush.msra.mxu1 %v210_v1  ;;  %1216 = vmatpush.msra.mxu3 %v210_v1  ;;  %v208_v5 = vld [vmem:[#allocation3 + $0xe8] sm:$0xff]  ;;  %v191_v6 = vld [vmem:[#allocation3 + $0x60] sm:$0xff]  ;;  %v190_v8 = vld [vmem:[#allocation3 + $0x58] sm:$0xff] }
   0xf   :  { %212 = vmatpush.msra.mxu0 %v193_v2  ;;  %1201 = vmatpush.msra.mxu2 %v193_v2  ;;  %v207_v7 = vld [vmem:[#allocation3 + $0xe0] sm:$0xff]  ;;  %v206_v9 = vld [vmem:[#allocation3 + $0xd8] sm:$0xff]  ;;  %v189_v10 = vld [vmem:[#allocation3 + $0x50] sm:$0xff] }
  0x10   :  { %325 = vmatpush.msra.mxu1 %v209_v3  ;;  %1217 = vmatpush.msra.mxu3 %v209_v3  ;;  %v205_v11 = vld [vmem:[#allocation3 + $0xd0] sm:$0xff]  ;;  %v188_v12 = vld [vmem:[#allocation3 + $0x48] sm:$0xff]  ;;  %v187_v14 = vld [vmem:[#allocation3 + $0x40] sm:$0xff] }
  0x11   :  { %213 = vmatpush.msra.mxu0 %v192_v4  ;;  %1202 = vmatpush.msra.mxu2 %v192_v4  ;;  %v204_v13 = vld [vmem:[#allocation3 + $0xc8] sm:$0xff]  ;;  %v203_v15 = vld [vmem:[#allocation3 + $0xc0] sm:$0xff]  ;;  %v186_v16 = vld [vmem:[#allocation3 + $0x38] sm:$0xff] }
  0x12   :  { %326 = vmatpush.msra.mxu1 %v208_v5  ;;  %1218 = vmatpush.msra.mxu3 %v208_v5  ;;  %v202_v17 = vld [vmem:[#allocation3 + $0xb8] sm:$0xff]  ;;  %v185_v18 = vld [vmem:[#allocation3 + $0x30] sm:$0xff]  ;;  %v184_v20 = vld [vmem:[#allocation3 + $0x28] sm:$0xff] }
  0x13   :  { %214 = vmatpush.msra.mxu0 %v191_v6  ;;  %1203 = vmatpush.msra.mxu2 %v191_v6  ;;  %v201_v19 = vld [vmem:[#allocation3 + $0xb0] sm:$0xff]  ;;  %v200_v21 = vld [vmem:[#allocation3 + $0xa8] sm:$0xff]  ;;  %v183_v22 = vld [vmem:[#allocation3 + $0x20] sm:$0xff] }
  0x14   :  { %327 = vmatpush.msra.mxu1 %v207_v7  ;;  %1219 = vmatpush.msra.mxu3 %v207_v7  ;;  %v199_v23 = vld [vmem:[#allocation3 + $0xa0] sm:$0xff]  ;;  %v182_v24 = vld [vmem:[#allocation3 + $0x18] sm:$0xff]  ;;  %v181_v26 = vld [vmem:[#allocation3 + $0x10] sm:$0xff] }
  0x15   :  { %215 = vmatpush.msra.mxu0 %v190_v8  ;;  %1204 = vmatpush.msra.mxu2 %v190_v8  ;;  %v198_v25 = vld [vmem:[#allocation3 + $0x98] sm:$0xff]  ;;  %v197_v27 = vld [vmem:[#allocation3 + $0x90] sm:$0xff]  ;;  %v180_v28 = vld [vmem:[#allocation3 + $0x8] sm:$0xff] }
  0x16   :  { %328 = vmatpush.msra.mxu1 %v206_v9  ;;  %1220 = vmatpush.msra.mxu3 %v206_v9  ;;  %v196_v29 = vld [vmem:[#allocation3 + $0x88] sm:$0xff]  ;;  %v179_v30 = vld [vmem:[#allocation3] sm:$0xff]  ;;  %v117_v36 = vld [vmem:[#allocation6 + $0x10] sm:$0xff] }
  0x17   :  { %216 = vmatpush.msra.mxu0 %v189_v10  ;;  %1205 = vmatpush.msra.mxu2 %v189_v10  ;;  %v195_v31 = vld [vmem:[#allocation3 + $0x80] sm:$0xff]  ;;  %v116_v34 = vld [vmem:[#allocation6 + $0x8] sm:$0xff]  ;;  %v149_v37 = vld [vmem:[#allocation6 + $0x110] sm:$0xff] }
  0x18   :  { %329 = vmatpush.msra.mxu1 %v205_v11  ;;  %1221 = vmatpush.msra.mxu3 %v205_v11  ;;  %v115_v32 = vld [vmem:[#allocation6] sm:$0xff]  ;;  %v148_v35 = vld [vmem:[#allocation6 + $0x108] sm:$0xff]  ;;  %v118_v38 = vld [vmem:[#allocation6 + $0x18] sm:$0xff] }
  0x19   :  { %217 = vmatpush.msra.mxu0 %v188_v12  ;;  %1206 = vmatpush.msra.mxu2 %v188_v12  ;;  %v147_v33 = vld [vmem:[#allocation6 + $0x100] sm:$0xff]  ;;  %v150_v39 = vld [vmem:[#allocation6 + $0x118] sm:$0xff]  ;;  %v120_v42 = vld [vmem:[#allocation6 + $0x28] sm:$0xff] }
  0x1a   :  { %330 = vmatpush.msra.mxu1 %v204_v13  ;;  %1222 = vmatpush.msra.mxu3 %v204_v13  ;;  %v119_v40 = vld [vmem:[#allocation6 + $0x20] sm:$0xff]  ;;  %v152_v43 = vld [vmem:[#allocation6 + $0x128] sm:$0xff]  ;;  %v121_v44 = vld [vmem:[#allocation6 + $0x30] sm:$0xff] }
  0x1b   :  { %218 = vmatpush.msra.mxu0 %v187_v14  ;;  %1207 = vmatpush.msra.mxu2 %v187_v14  ;;  %v151_v41 = vld [vmem:[#allocation6 + $0x120] sm:$0xff]  ;;  %v153_v45 = vld [vmem:[#allocation6 + $0x130] sm:$0xff]  ;;  %v122_v46 = vld [vmem:[#allocation6 + $0x38] sm:$0xff] }
  0x1c   :  { %331 = vmatpush.msra.mxu1 %v203_v15  ;;  %1223 = vmatpush.msra.mxu3 %v203_v15  ;;  %v154_v47 = vld [vmem:[#allocation6 + $0x138] sm:$0xff]  ;;  %v123_v48 = vld [vmem:[#allocation6 + $0x40] sm:$0xff]  ;;  %v124_v50 = vld [vmem:[#allocation6 + $0x48] sm:$0xff] }
  0x1d   :  { %219 = vmatpush.msra.mxu0 %v186_v16  ;;  %1208 = vmatpush.msra.mxu2 %v186_v16  ;;  %v155_v49 = vld [vmem:[#allocation6 + $0x140] sm:$0xff]  ;;  %v156_v51 = vld [vmem:[#allocation6 + $0x148] sm:$0xff]  ;;  %v125_v52 = vld [vmem:[#allocation6 + $0x50] sm:$0xff] }
  0x1e   :  { %332 = vmatpush.msra.mxu1 %v202_v17  ;;  %1224 = vmatpush.msra.mxu3 %v202_v17  ;;  %v157_v53 = vld [vmem:[#allocation6 + $0x150] sm:$0xff]  ;;  %v126_v54 = vld [vmem:[#allocation6 + $0x58] sm:$0xff]  ;;  %v127_v56 = vld [vmem:[#allocation6 + $0x60] sm:$0xff] }
  0x1f   :  { %220 = vmatpush.msra.mxu0 %v185_v18  ;;  %1209 = vmatpush.msra.mxu2 %v185_v18  ;;  %v158_v55 = vld [vmem:[#allocation6 + $0x158] sm:$0xff]  ;;  %v159_v57 = vld [vmem:[#allocation6 + $0x160] sm:$0xff]  ;;  %v128_v58 = vld [vmem:[#allocation6 + $0x68] sm:$0xff] }
  0x20   :  { %333 = vmatpush.msra.mxu1 %v201_v19  ;;  %1225 = vmatpush.msra.mxu3 %v201_v19  ;;  %v160_v59 = vld [vmem:[#allocation6 + $0x168] sm:$0xff]  ;;  %v129_v60 = vld [vmem:[#allocation6 + $0x70] sm:$0xff]  ;;  %v130_v62 = vld [vmem:[#allocation6 + $0x78] sm:$0xff] }
  0x21   :  { %221 = vmatpush.msra.mxu0 %v184_v20  ;;  %1210 = vmatpush.msra.mxu2 %v184_v20  ;;  %v161_v61 = vld [vmem:[#allocation6 + $0x170] sm:$0xff]  ;;  %v162_v63 = vld [vmem:[#allocation6 + $0x178] sm:$0xff]  ;;  %v131_v0 = vld [vmem:[#allocation6 + $0x80] sm:$0xff] }
  0x22   :  { %334 = vmatpush.msra.mxu1 %v200_v21  ;;  %1226 = vmatpush.msra.mxu3 %v200_v21  ;;  %v163_v1 = vld [vmem:[#allocation6 + $0x180] sm:$0xff]  ;;  %v132_v2 = vld [vmem:[#allocation6 + $0x88] sm:$0xff]  ;;  %v133_v4 = vld [vmem:[#allocation6 + $0x90] sm:$0xff] }
  0x23   :  { %222 = vmatpush.msra.mxu0 %v183_v22  ;;  %1211 = vmatpush.msra.mxu2 %v183_v22  ;;  %v164_v3 = vld [vmem:[#allocation6 + $0x188] sm:$0xff]  ;;  %v165_v5 = vld [vmem:[#allocation6 + $0x190] sm:$0xff]  ;;  %v134_v6 = vld [vmem:[#allocation6 + $0x98] sm:$0xff] }
  0x24   :  { %335 = vmatpush.msra.mxu1 %v199_v23  ;;  %1227 = vmatpush.msra.mxu3 %v199_v23  ;;  %v166_v7 = vld [vmem:[#allocation6 + $0x198] sm:$0xff]  ;;  %v135_v8 = vld [vmem:[#allocation6 + $0xa0] sm:$0xff]  ;;  %v136_v10 = vld [vmem:[#allocation6 + $0xa8] sm:$0xff] }
  0x25   :  { %223 = vmatpush.msra.mxu0 %v182_v24  ;;  %1212 = vmatpush.msra.mxu2 %v182_v24  ;;  %v167_v9 = vld [vmem:[#allocation6 + $0x1a0] sm:$0xff]  ;;  %v168_v11 = vld [vmem:[#allocation6 + $0x1a8] sm:$0xff]  ;;  %v137_v12 = vld [vmem:[#allocation6 + $0xb0] sm:$0xff] }
  0x26   :  { %336 = vmatpush.msra.mxu1 %v198_v25  ;;  %1228 = vmatpush.msra.mxu3 %v198_v25  ;;  %v169_v13 = vld [vmem:[#allocation6 + $0x1b0] sm:$0xff]  ;;  %v138_v14 = vld [vmem:[#allocation6 + $0xb8] sm:$0xff]  ;;  %v139_v16 = vld [vmem:[#allocation6 + $0xc0] sm:$0xff] }
  0x27   :  { %224 = vmatpush.msra.mxu0 %v181_v26  ;;  %1213 = vmatpush.msra.mxu2 %v181_v26  ;;  %v170_v15 = vld [vmem:[#allocation6 + $0x1b8] sm:$0xff]  ;;  %v171_v17 = vld [vmem:[#allocation6 + $0x1c0] sm:$0xff]  ;;  %v140_v18 = vld [vmem:[#allocation6 + $0xc8] sm:$0xff] }
  0x28   :  { %337 = vmatpush.msra.mxu1 %v197_v27  ;;  %1229 = vmatpush.msra.mxu3 %v197_v27  ;;  %v172_v19 = vld [vmem:[#allocation6 + $0x1c8] sm:$0xff]  ;;  %v141_v20 = vld [vmem:[#allocation6 + $0xd0] sm:$0xff]  ;;  %v142_v22 = vld [vmem:[#allocation6 + $0xd8] sm:$0xff] }
  0x29   :  { %225 = vmatpush.msra.mxu0 %v180_v28  ;;  %1214 = vmatpush.msra.mxu2 %v180_v28  ;;  %v173_v21 = vld [vmem:[#allocation6 + $0x1d0] sm:$0xff]  ;;  %v174_v23 = vld [vmem:[#allocation6 + $0x1d8] sm:$0xff]  ;;  %v143_v24 = vld [vmem:[#allocation6 + $0xe0] sm:$0xff] }
  0x2a   :  { %338 = vmatpush.msra.mxu1 %v196_v29  ;;  %1230 = vmatpush.msra.mxu3 %v196_v29  ;;  %v175_v25 = vld [vmem:[#allocation6 + $0x1e0] sm:$0xff]  ;;  %v144_v26 = vld [vmem:[#allocation6 + $0xe8] sm:$0xff]  ;;  %v145_v28 = vld [vmem:[#allocation6 + $0xf0] sm:$0xff] }
  0x2b   :  { %226 = vmatpush.msra.mxu0 %v179_v30  ;;  %1215 = vmatpush.msra.mxu2 %v179_v30  ;;  %v176_v27 = vld [vmem:[#allocation6 + $0x1e8] sm:$0xff]  ;;  %v177_v29 = vld [vmem:[#allocation6 + $0x1f0] sm:$0xff]  ;;  %v146_v30 = vld [vmem:[#allocation6 + $0xf8] sm:$0xff] }
  0x2c   :  { %339 = vmatpush.msra.mxu1 %v195_v31  ;;  %1231 = vmatpush.msra.mxu3 %v195_v31  ;;  %v178_v31 = vld [vmem:[#allocation6 + $0x1f8] sm:$0xff] }
  0x2d   :  { %227 = vmatmul.f32.vlgmr.msra.gmra.mxu0 %v115_v32  ;;  %275 = vmatmul.f32.vlgmr.msra.gmra.mxu2 %v147_v33  ;;  %v1486_v33 = vld [vmem:[%s1899_s2] ss:$0 sm:$0xff] }
  0x2e   :  { %340 = vmatmul.f32.vlgmr.msra.gmra.mxu1 %v116_v34  ;;  %388 = vmatmul.f32.vlgmr.msra.gmra.mxu3 %v148_v35 }
  0x35   :  { %230 = vmatmul.f32.gmra.mxu0 %v117_v36  ;;  %278 = vmatmul.f32.gmra.mxu2 %v149_v37 }
  0x36   :  { %343 = vmatmul.f32.gmra.mxu1 %v118_v38  ;;  %391 = vmatmul.f32.gmra.mxu3 %v150_v39 }
  0x3d   :  { %233 = vmatmul.f32.gmra.mxu0 %v119_v40  ;;  %281 = vmatmul.f32.gmra.mxu2 %v151_v41 }
  0x3e   :  { %346 = vmatmul.f32.gmra.mxu1 %v120_v42  ;;  %394 = vmatmul.f32.gmra.mxu3 %v152_v43 }
  0x45   :  { %236 = vmatmul.f32.gmra.mxu0 %v121_v44  ;;  %284 = vmatmul.f32.gmra.mxu2 %v153_v45 }
  0x46   :  { %349 = vmatmul.f32.gmra.mxu1 %v122_v46  ;;  %397 = vmatmul.f32.gmra.mxu3 %v154_v47 }
  0x4d   :  { %239 = vmatmul.f32.gmra.mxu0 %v123_v48  ;;  %287 = vmatmul.f32.gmra.mxu2 %v155_v49 }
  0x4e   :  { %352 = vmatmul.f32.gmra.mxu1 %v124_v50  ;;  %400 = vmatmul.f32.gmra.mxu3 %v156_v51 }
  0x55   :  { %242 = vmatmul.f32.gmra.mxu0 %v125_v52  ;;  %290 = vmatmul.f32.gmra.mxu2 %v157_v53 }
  0x56   :  { %355 = vmatmul.f32.gmra.mxu1 %v126_v54  ;;  %403 = vmatmul.f32.gmra.mxu3 %v158_v55 }
  0x5d   :  { %245 = vmatmul.f32.gmra.mxu0 %v127_v56  ;;  %293 = vmatmul.f32.gmra.mxu2 %v159_v57 }
  0x5e   :  { %358 = vmatmul.f32.gmra.mxu1 %v128_v58  ;;  %406 = vmatmul.f32.gmra.mxu3 %v160_v59 }
  0x65   :  { %248 = vmatmul.f32.gmra.mxu0 %v129_v60  ;;  %296 = vmatmul.f32.gmra.mxu2 %v161_v61 }
  0x66   :  { %361 = vmatmul.f32.gmra.mxu1 %v130_v62  ;;  %409 = vmatmul.f32.gmra.mxu3 %v162_v63 }
  0x6d   :  { %251 = vmatmul.f32.gmra.mxu0 %v131_v0  ;;  %299 = vmatmul.f32.gmra.mxu2 %v163_v1 }
  0x6e   :  { %364 = vmatmul.f32.gmra.mxu1 %v132_v2  ;;  %412 = vmatmul.f32.gmra.mxu3 %v164_v3 }
  0x75   :  { %254 = vmatmul.f32.gmra.mxu0 %v133_v4  ;;  %302 = vmatmul.f32.gmra.mxu2 %v165_v5 }
  0x76   :  { %367 = vmatmul.f32.gmra.mxu1 %v134_v6  ;;  %415 = vmatmul.f32.gmra.mxu3 %v166_v7 }
  0x7d   :  { %257 = vmatmul.f32.gmra.mxu0 %v135_v8  ;;  %305 = vmatmul.f32.gmra.mxu2 %v167_v9 }
  0x7e   :  { %370 = vmatmul.f32.gmra.mxu1 %v136_v10  ;;  %418 = vmatmul.f32.gmra.mxu3 %v168_v11 }
  0x85   :  { %260 = vmatmul.f32.gmra.mxu0 %v137_v12  ;;  %308 = vmatmul.f32.gmra.mxu2 %v169_v13 }
  0x86   :  { %373 = vmatmul.f32.gmra.mxu1 %v138_v14  ;;  %421 = vmatmul.f32.gmra.mxu3 %v170_v15 }
  0x8d   :  { %263 = vmatmul.f32.gmra.mxu0 %v139_v16  ;;  %311 = vmatmul.f32.gmra.mxu2 %v171_v17 }
  0x8e   :  { %376 = vmatmul.f32.gmra.mxu1 %v140_v18  ;;  %424 = vmatmul.f32.gmra.mxu3 %v172_v19 }
  0x95   :  { %266 = vmatmul.f32.gmra.mxu0 %v141_v20  ;;  %314 = vmatmul.f32.gmra.mxu2 %v173_v21 }
  0x96   :  { %379 = vmatmul.f32.gmra.mxu1 %v142_v22  ;;  %427 = vmatmul.f32.gmra.mxu3 %v174_v23 }
  0x9d   :  { %269 = vmatmul.f32.gmra.mxu0 %v143_v24  ;;  %317 = vmatmul.f32.gmra.mxu2 %v175_v25 }
  0x9e   :  { %382 = vmatmul.f32.gmra.mxu1 %v144_v26  ;;  %430 = vmatmul.f32.gmra.mxu3 %v176_v27 }
  0xa5   :  { %272 = vmatmul.f32.gmra.mxu0 %v145_v28  ;;  %320 = vmatmul.f32.gmra.mxu2 %v177_v29 }
  0xa6   :  { %385 = vmatmul.f32.gmra.mxu1 %v146_v30  ;;  %433 = vmatmul.f32.gmra.mxu3 %v178_v31 }
  0xaa   :  { %v228_v32 = vpop.f32.mrf.mxu0 }
  0xab   :  { %v341_v34 = vpop.f32.mrf.mxu1 }
  0xac   :  { %v342_v35 = vadd.f32 %v341_v34, %v228_v32 }
  0xae   :  { %v1489_v36 = vadd.f32 %v1486_v33, %v342_v35 }
  0xb0   :  { %v668_v37 = vand.u32 2147483647, %v1489_v36  ;;  %v276_v38 = vpop.f32.mrf.mxu2  ;;  %v572_v19 = vmax.f32 %v1489_v36, 0.0  ;;  %vm604_vm0 = vcmp.ne.f32.partialorder %v1489_v36, %v1489_v36 }
  0xb1   :  { %v389_v39 = vpop.f32.mrf.mxu3 }
  0xb2   :  { %v700_v40 = vsub.f32 0.0, %v668_v37  ;;  %v390_v41 = vadd.f32 %v389_v39, %v276_v38  ;;  %v231_v42 = vpop.f32.mrf.mxu0 }
  0xb3   :  { %v344_v43 = vpop.f32.mrf.mxu1 }
  0xb4   :  { %v732_v44 = vmul.f32 1.442695, %v700_v40  ;;  %v1493_v45 = vadd.f32 %v1486_v33, %v390_v41  ;;  %v345_v46 = vadd.f32 %v344_v43, %v231_v42 }
  0xb6   :  { %1240 = vpow2.f32 %v732_v44  ;;  %v684_v47 = vand.u32 2147483647, %v1493_v45  ;;  %v1497_v48 = vadd.f32 %v1486_v33, %v345_v46  ;;  %v588_v34 = vmax.f32 %v1493_v45, 0.0 }
  0xb7   :  { %vm620_vm2 = vcmp.ne.f32.partialorder %v1493_v45, %v1493_v45 }
  0xb8   :  { %v716_v49 = vsub.f32 0.0, %v684_v47  ;;  %v279_v50 = vpop.f32.mrf.mxu2  ;;  %v669_v51 = vand.u32 2147483647, %v1497_v48  ;;  %v573_v39 = vmax.f32 %v1497_v48, 0.0  ;;  %vm605_vm3 = vcmp.ne.f32.partialorder %v1497_v48, %v1497_v48 }
  0xb9   :  { %v392_v52 = vpop.f32.mrf.mxu3 }
  0xba   :  { %v764_v53 = vmul.f32 1.442695, %v716_v49  ;;  %v393_v54 = vadd.f32 %v392_v52, %v279_v50  ;;  %v234_v55 = vpop.f32.mrf.mxu0  ;;  %v701_v56 = vsub.f32 0.0, %v669_v51 }
  0xbb   :  { %v347_v57 = vpop.f32.mrf.mxu1 }
  0xbc   :  { %v1241_v58 = vpop.eup %1240  ;;  %1242 = vpow2.f32 %v764_v53  ;;  %v1501_v59 = vadd.f32 %v1486_v33, %v393_v54  ;;  %v348_v60 = vadd.f32 %v347_v57, %v234_v55  ;;  %v734_v62 = vmul.f32 1.442695, %v701_v56 }
  0xbd   :  { %v796_v61 = vadd.f32 1.0, %v1241_v58  ;;  %v799_v63 = vmul.f32 -0.5, %v1241_v58  ;;  %v802_v11 = vand.u32 2147483647, %v1241_v58 }
  0xbe   :  { %v685_v0 = vand.u32 2147483647, %v1501_v59  ;;  %v1505_v1 = vadd.f32 %v1486_v33, %v348_v60  ;;  %vm621_vm6 = vcmp.ne.f32.partialorder %v1501_v59, %v1501_v59 }
  0xbf   :  { %1244 = vlog2.f32 %v796_v61  ;;  %v800_v7 = vadd.f32 1.0, %v799_v63  ;;  %vm803_vm1 = vcmp.lt.f32.partialorder %v802_v11, 0.0004427343 }
  0xc0   :  { %1246 = vpow2.f32 %v734_v62  ;;  %v717_v2 = vsub.f32 0.0, %v685_v0  ;;  %v282_v3 = vpop.f32.mrf.mxu2  ;;  %v670_v4 = vand.u32 2147483647, %v1505_v1  ;;  %vm606_vm7 = vcmp.ne.f32.partialorder %v1505_v1, %v1505_v1 }
  0xc1   :  { %v395_v5 = vpop.f32.mrf.mxu3  ;;  %v801_v23 = vmul.f32 %v1241_v58, %v800_v7 }
  0xc2   :  { %v1243_v6 = vpop.eup %1242  ;;  %v766_v8 = vmul.f32 1.442695, %v717_v2  ;;  %v396_v9 = vadd.f32 %v395_v5, %v282_v3  ;;  %v237_v10 = vpop.f32.mrf.mxu0  ;;  %v702_v14 = vsub.f32 0.0, %v670_v4 }
  0xc3   :  { %v940_v12 = vadd.f32 1.0, %v1243_v6  ;;  %v943_v13 = vmul.f32 -0.5, %v1243_v6  ;;  %v350_v15 = vpop.f32.mrf.mxu1  ;;  %v946_v35 = vand.u32 2147483647, %v1243_v6 }
  0xc4   :  { %1248 = vpow2.f32 %v766_v8  ;;  %v1509_v16 = vadd.f32 %v1486_v33, %v396_v9  ;;  %v351_v17 = vadd.f32 %v350_v15, %v237_v10  ;;  %v736_v20 = vmul.f32 1.442695, %v702_v14 }
  0xc5   :  { %v1245_v18 = vpop.eup %1244  ;;  %1250 = vlog2.f32 %v940_v12  ;;  %v944_v25 = vadd.f32 1.0, %v943_v13  ;;  %vm947_vm4 = vcmp.lt.f32.partialorder %v946_v35, 0.0004427343  ;;  %v574_v12 = vmax.f32 %v1505_v1, 0.0 }
  0xc6   :  { %v1247_v21 = vpop.eup %1246  ;;  %v798_v22 = vmul.f32 0.6931472, %v1245_v18  ;;  %v686_v24 = vand.u32 2147483647, %v1509_v16  ;;  %1252 = vpow2.f32 %v736_v20  ;;  %v1516_v30 = vadd.f32 %v1486_v33, %v351_v17 }
  0xc7   :  { %v805_v26 = vadd.f32 1.0, %v1247_v21  ;;  %v808_v27 = vmul.f32 -0.5, %v1247_v21  ;;  %v945_v46 = vmul.f32 %v1243_v6, %v944_v25  ;;  %v811_v54 = vand.u32 2147483647, %v1247_v21 }
  0xc8   :  { %v804_v28 = vsel %vm803_vm1, %v801_v23, %v798_v22  ;;  %v718_v29 = vsub.f32 0.0, %v686_v24  ;;  %v285_v31 = vpop.f32.mrf.mxu2  ;;  %v671_v41 = vand.u32 2147483647, %v1516_v30  ;;  %v590_v23 = vmax.f32 %v1509_v16, 0.0 }
  0xc9   :  { %v1084_v32 = vadd.f32 %v804_v28, %v572_v19  ;;  %1254 = vlog2.f32 %v805_v26  ;;  %v398_v37 = vpop.f32.mrf.mxu3  ;;  %v809_v47 = vadd.f32 1.0, %v808_v27  ;;  %vm812_vm5 = vcmp.lt.f32.partialorder %v811_v54, 0.0004427343 }
  0xca   :  { %v1249_v38 = vpop.eup %1248  ;;  %v768_v40 = vmul.f32 1.442695, %v718_v29  ;;  %v240_v42 = vpop.f32.mrf.mxu0  ;;  %v703_v53 = vsub.f32 0.0, %v671_v41  ;;  %v399_v55 = vadd.f32 %v398_v37, %v285_v31  ;;  %vm622_vm11 = vcmp.ne.f32.partialorder %v1509_v16, %v1509_v16 }
  0xcb   :  { %v1251_v43 = vpop.eup %1250  ;;  %v1116_v44 = vsel %vm604_vm0, %v1489_v36, %v1084_v32  ;;  %v949_v49 = vadd.f32 1.0, %v1249_v38  ;;  %v353_v50 = vpop.f32.mrf.mxu1  ;;  %v952_v52 = vmul.f32 -0.5, %v1249_v38  ;;  %v589_v36 = vmax.f32 %v1501_v59, 0.0 }
  0xcc   :  { %1148 = vst [vmem:[#allocation8] sm:$0xff] %v1116_v44  ;;  %v942_v51 = vmul.f32 0.6931472, %v1251_v43  ;;  %1256 = vpow2.f32 %v768_v40  ;;  %v1253_v56 = vpop.eup %1252  ;;  %v738_v58 = vmul.f32 1.442695, %v703_v53  ;;  %v354_v60 = vadd.f32 %v353_v50, %v240_v42 }
  0xcd   :  { %1258 = vlog2.f32 %v949_v49  ;;  %v810_v63 = vmul.f32 %v1247_v21, %v809_v47  ;;  %v814_v0 = vadd.f32 1.0, %v1253_v56  ;;  %v817_v2 = vmul.f32 -0.5, %v1253_v56 }
  0xce   :  { %v948_v57 = vsel %vm947_vm4, %v945_v46, %v942_v51  ;;  %v953_v4 = vadd.f32 1.0, %v952_v52  ;;  %1260 = vpow2.f32 %v738_v58  ;;  %v1531_v5 = vadd.f32 %v1486_v33, %v399_v55 }
  0xcf   :  { %v1255_v61 = vpop.eup %1254  ;;  %v1100_v62 = vadd.f32 %v948_v57, %v588_v34  ;;  %v955_v8 = vand.u32 2147483647, %v1249_v38  ;;  %1262 = vlog2.f32 %v814_v0  ;;  %v1541_v13 = vadd.f32 %v1486_v33, %v354_v60 }
  0xd0   :  { %v807_v3 = vmul.f32 0.6931472, %v1255_v61  ;;  %v288_v6 = vpop.f32.mrf.mxu2  ;;  %v818_v18 = vadd.f32 1.0, %v817_v2  ;;  %v954_v22 = vmul.f32 %v1249_v38, %v953_v4  ;;  %v687_v24 = vand.u32 2147483647, %v1531_v5 }
  0xd1   :  { %v1132_v7 = vsel %vm620_vm2, %v1493_v45, %v1100_v62  ;;  %v401_v9 = vpop.f32.mrf.mxu3  ;;  %vm956_vm8 = vcmp.lt.f32.partialorder %v955_v8, 0.0004427343  ;;  %v820_v26 = vand.u32 2147483647, %v1253_v56  ;;  %v672_v32 = vand.u32 2147483647, %v1541_v13 }
  0xd2   :  { %v1257_v10 = vpop.eup %1256  ;;  %1164 = vst [vmem:[#allocation8 + $0x80] sm:$0xff] %v1132_v7  ;;  %v813_v11 = vsel %vm812_vm5, %v810_v63, %v807_v3  ;;  %v243_v14 = vpop.f32.mrf.mxu0  ;;  %v719_v31 = vsub.f32 0.0, %v687_v24  ;;  %v819_v37 = vmul.f32 %v1253_v56, %v818_v18  ;;  %v402_v43 = vadd.f32 %v401_v9, %v288_v6 }
  0xd3   :  { %v1259_v15 = vpop.eup %1258  ;;  %v1085_v17 = vadd.f32 %v813_v11, %v573_v39  ;;  %v958_v45 = vadd.f32 1.0, %v1257_v10  ;;  %v961_v19 = vmul.f32 -0.5, %v1257_v10  ;;  %v356_v20 = vpop.f32.mrf.mxu1  ;;  %v964_v29 = vand.u32 2147483647, %v1257_v10 }
  0xd4   :  { %v951_v21 = vmul.f32 0.6931472, %v1259_v15  ;;  %v1261_v27 = vpop.eup %1260  ;;  %v770_v42 = vmul.f32 1.442695, %v719_v31  ;;  %vm821_vm9 = vcmp.lt.f32.partialorder %v820_v26, 0.0004427343  ;;  %v1561_v51 = vadd.f32 %v1486_v33, %v402_v43 }
  0xd5   :  { %v1117_v25 = vsel %vm605_vm3, %v1497_v48, %v1085_v17  ;;  %1264 = vlog2.f32 %v958_v45  ;;  %v1263_v34 = vpop.eup %1262  ;;  %v962_v38 = vadd.f32 1.0, %v961_v19  ;;  %v823_v39 = vadd.f32 1.0, %v1261_v27 }
  0xd6   :  { %1149 = vst [vmem:[#allocation8 + $0x8] sm:$0xff] %v1117_v25  ;;  %v957_v28 = vsel %vm956_vm8, %v954_v22, %v951_v21  ;;  %v816_v40 = vmul.f32 0.6931472, %v1263_v34  ;;  %v826_v41 = vmul.f32 -0.5, %v1261_v27  ;;  %v704_v46 = vsub.f32 0.0, %v672_v32 }
  0xd7   :  { %v1101_v35 = vadd.f32 %v957_v28, %v589_v36  ;;  %1266 = vlog2.f32 %v823_v39  ;;  %vm1556_vm10 = vcmp.lt.f32.partialorder %v964_v29, 0.0004427343  ;;  %v829_v55 = vand.u32 2147483647, %v1261_v27 }
  0xd8   :  { %v291_v48 = vpop.f32.mrf.mxu2  ;;  %v822_v49 = vsel %vm821_vm9, %v819_v37, %v816_v40  ;;  %1268 = vpow2.f32 %v770_v42  ;;  %v740_v56 = vmul.f32 1.442695, %v704_v46  ;;  %v963_v58 = vmul.f32 %v1257_v10, %v962_v38 }
  0xd9   :  { %v1133_v44 = vsel %vm621_vm6, %v1501_v59, %v1101_v35  ;;  %v404_v47 = vpop.f32.mrf.mxu3  ;;  %v1086_v54 = vadd.f32 %v822_v49, %v574_v12  ;;  %v357_v59 = vadd.f32 %v356_v20, %v243_v14  ;;  %v827_v60 = vadd.f32 1.0, %v826_v41 }
  0xda   :  { %1165 = vst [vmem:[#allocation8 + $0x88] sm:$0xff] %v1133_v44  ;;  %v246_v52 = vpop.f32.mrf.mxu0  ;;  %v688_v61 = vand.u32 2147483647, %v1561_v51  ;;  %1270 = vpow2.f32 %v740_v56  ;;  %v405_v0 = vadd.f32 %v404_v47, %v291_v48  ;;  %vm830_vm12 = vcmp.lt.f32.partialorder %v829_v55, 0.0004427343 }
  0xdb   :  { %v1265_v53 = vpop.eup %1264  ;;  %v359_v57 = vpop.f32.mrf.mxu1  ;;  %v1118_v62 = vsel %vm606_vm7, %v1505_v1, %v1086_v54  ;;  %v1569_v63 = vadd.f32 %v1486_v33, %v357_v59  ;;  %v575_v1 = vmax.f32 %v1516_v30, 0.0  ;;  %v828_v11 = vmul.f32 %v1261_v27, %v827_v60 }
  0xdc   :  { %v960_v36 = vmul.f32 0.6931472, %v1265_v53  ;;  %1150 = vst [vmem:[#allocation8 + $0x10] sm:$0xff] %v1118_v62  ;;  %v720_v3 = vsub.f32 0.0, %v688_v61  ;;  %v360_v8 = vadd.f32 %v359_v57, %v246_v52  ;;  %v1579_v18 = vadd.f32 %v1486_v33, %v405_v0 }
  0xdd   :  { %v1267_v4 = vpop.eup %1266  ;;  %v673_v7 = vand.u32 2147483647, %v1569_v63  ;;  %vm607_vm13 = vcmp.ne.f32.partialorder %v1516_v30, %v1516_v30  ;;  %v591_v39 = vmax.f32 %v1531_v5, 0.0  ;;  %vm623_vm14 = vcmp.ne.f32.partialorder %v1531_v5, %v1531_v5 }
  0xde   :  { %v966_v2 = vsel %vm1556_vm10, %v963_v58, %v960_v36  ;;  %v1269_v9 = vpop.eup %1268  ;;  %v825_v10 = vmul.f32 0.6931472, %v1267_v4  ;;  %v772_v12 = vmul.f32 1.442695, %v720_v3  ;;  %v1582_v25 = vadd.f32 %v1486_v33, %v360_v8 }
  0xdf   :  { %v1102_v6 = vadd.f32 %v966_v2, %v590_v23  ;;  %v967_v17 = vadd.f32 1.0, %v1269_v9  ;;  %v970_v20 = vmul.f32 -0.5, %v1269_v9  ;;  %v705_v21 = vsub.f32 0.0, %v673_v7 }
  0xe0   :  { %v294_v14 = vpop.f32.mrf.mxu2  ;;  %v831_v19 = vsel %vm830_vm12, %v828_v11, %v825_v10  ;;  %1272 = vpow2.f32 %v772_v12  ;;  %v1271_v23 = vpop.eup %1270  ;;  %v689_v31 = vand.u32 2147483647, %v1579_v18  ;;  %v973_v34 = vand.u32 2147483647, %v1269_v9 }
  0xe1   :  { %v1134_v15 = vsel %vm622_vm11, %v1509_v16, %v1102_v6  ;;  %v407_v45 = vpop.f32.mrf.mxu3  ;;  %v1087_v24 = vadd.f32 %v831_v19, %v575_v1  ;;  %1274 = vlog2.f32 %v967_v17  ;;  %v832_v16 = vadd.f32 1.0, %v1271_v23 }
  0xe2   :  { %1166 = vst [vmem:[#allocation8 + $0x90] sm:$0xff] %v1134_v15  ;;  %v249_v22 = vpop.f32.mrf.mxu0  ;;  %v742_v27 = vmul.f32 1.442695, %v705_v21  ;;  %v835_v29 = vmul.f32 -0.5, %v1271_v23  ;;  %v971_v32 = vadd.f32 1.0, %v970_v20  ;;  %v721_v35 = vsub.f32 0.0, %v689_v31 }
  0xe3   :  { %v362_v26 = vpop.f32.mrf.mxu1  ;;  %v1119_v28 = vsel %vm607_vm13, %v1516_v30, %v1087_v24  ;;  %1276 = vlog2.f32 %v832_v16  ;;  %v674_v37 = vand.u32 2147483647, %v1582_v25  ;;  %v838_v40 = vand.u32 2147483647, %v1271_v23 }
  0xe4   :  { %1151 = vst [vmem:[#allocation8 + $0x18] sm:$0xff] %v1119_v28  ;;  %1278 = vpow2.f32 %v742_v27  ;;  %v408_v41 = vadd.f32 %v407_v45, %v294_v14  ;;  %vm608_vm15 = vcmp.ne.f32.partialorder %v1541_v13, %v1541_v13  ;;  %v836_v43 = vadd.f32 1.0, %v835_v29 }
  0xe5   :  { %v774_v44 = vmul.f32 1.442695, %v721_v35  ;;  %v363_v46 = vadd.f32 %v362_v26, %v249_v22  ;;  %v972_v50 = vmul.f32 %v1269_v9, %v971_v32  ;;  %v706_v53 = vsub.f32 0.0, %v674_v37 }
  0xe6   :  { %v1273_v38 = vpop.eup %1272  ;;  %vm974_vm0 = vcmp.lt.f32.partialorder %v973_v34, 0.0004427343  ;;  %v576_v55 = vmax.f32 %v1541_v13, 0.0  ;;  %v1596_v56 = vadd.f32 %v1486_v33, %v408_v41  ;;  %vm1598_vm1 = vcmp.lt.f32.partialorder %v838_v40, 0.0004427343 }
  0xe7   :  { %v1275_v42 = vpop.eup %1274  ;;  %v976_v48 = vadd.f32 1.0, %v1273_v38  ;;  %v979_v52 = vmul.f32 -0.5, %v1273_v38  ;;  %v744_v60 = vmul.f32 1.442695, %v706_v53  ;;  %v837_v2 = vmul.f32 %v1271_v23, %v836_v43 }
  0xe8   :  { %v297_v30 = vpop.f32.mrf.mxu2  ;;  %v969_v49 = vmul.f32 0.6931472, %v1275_v42  ;;  %v1603_v3 = vadd.f32 %v1486_v33, %v363_v46  ;;  %v982_v1 = vand.u32 2147483647, %v1273_v38  ;;  %v690_v10 = vand.u32 2147483647, %v1596_v56 }
  0xe9   :  { %v410_v47 = vpop.f32.mrf.mxu3  ;;  %1280 = vlog2.f32 %v976_v48  ;;  %v1277_v57 = vpop.eup %1276  ;;  %v980_v4 = vadd.f32 1.0, %v979_v52  ;;  %v592_v12 = vmax.f32 %v1561_v51, 0.0  ;;  %vm624_vm2 = vcmp.ne.f32.partialorder %v1561_v51, %v1561_v51 }
  0xea   :  { %v252_v54 = vpop.f32.mrf.mxu0  ;;  %v975_v36 = vsel %vm974_vm0, %v972_v50, %v969_v49  ;;  %1282 = vpow2.f32 %v774_v44  ;;  %v1279_v61 = vpop.eup %1278  ;;  %v834_v0 = vmul.f32 0.6931472, %v1277_v57  ;;  %v411_v14 = vadd.f32 %v410_v47, %v297_v30 }
  0xeb   :  { %v365_v59 = vpop.f32.mrf.mxu1  ;;  %v1103_v62 = vadd.f32 %v975_v36, %v591_v39  ;;  %v841_v6 = vadd.f32 1.0, %v1279_v61  ;;  %v844_v7 = vmul.f32 -0.5, %v1279_v61  ;;  %1284 = vpow2.f32 %v744_v60 }
  0xec   :  { %v840_v9 = vsel %vm1598_vm1, %v837_v2, %v834_v0  ;;  %v577_v45 = vmax.f32 %v1569_v63, 0.0  ;;  %v675_v19 = vand.u32 2147483647, %v1603_v3  ;;  %v981_v24 = vmul.f32 %v1273_v38, %v980_v4 }
  0xed   :  { %v1135_v8 = vsel %vm623_vm14, %v1531_v5, %v1103_v62  ;;  %v1088_v11 = vadd.f32 %v840_v9, %v576_v55  ;;  %1286 = vlog2.f32 %v841_v6  ;;  %v722_v5 = vsub.f32 0.0, %v690_v10 }
  0xee   :  { %1167 = vst [vmem:[#allocation8 + $0x98] sm:$0xff] %v1135_v8  ;;  %v845_v26 = vadd.f32 1.0, %v844_v7  ;;  %vm983_vm3 = vcmp.lt.f32.partialorder %v982_v1, 0.0004427343  ;;  %vm609_vm4 = vcmp.ne.f32.partialorder %v1569_v63, %v1569_v63  ;;  %v707_v28 = vsub.f32 0.0, %v675_v19 }
  0xef   :  { %v1281_v17 = vpop.eup %1280  ;;  %v1120_v22 = vsel %vm608_vm15, %v1541_v13, %v1088_v11  ;;  %v847_v32 = vand.u32 2147483647, %v1279_v61  ;;  %v776_v34 = vmul.f32 1.442695, %v722_v5  ;;  %v1626_v35 = vadd.f32 %v1486_v33, %v411_v14 }
  0xf0   :  { %v300_v15 = vpop.f32.mrf.mxu2  ;;  %v1283_v21 = vpop.eup %1282  ;;  %v978_v23 = vmul.f32 0.6931472, %v1281_v17  ;;  %1152 = vst [vmem:[#allocation8 + $0x20] sm:$0xff] %v1120_v22  ;;  %v593_v39 = vmax.f32 %v1579_v18, 0.0  ;;  %v366_v40 = vadd.f32 %v365_v59, %v252_v54  ;;  %v846_v30 = vmul.f32 %v1279_v61, %v845_v26 }
  0xf1   :  { %v413_v20 = vpop.f32.mrf.mxu3  ;;  %v985_v16 = vadd.f32 1.0, %v1283_v21  ;;  %v988_v27 = vmul.f32 -0.5, %v1283_v21  ;;  %v1623_v29 = vpop.eup %1284  ;;  %v746_v47 = vmul.f32 1.442695, %v707_v28  ;;  %vm848_vm5 = vcmp.lt.f32.partialorder %v847_v32, 0.0004427343 }
  0xf2   :  { %v984_v31 = vsel %vm983_vm3, %v981_v24, %v978_v23  ;;  %v255_v13 = vpop.f32.mrf.mxu0  ;;  %v850_v42 = vadd.f32 1.0, %v1623_v29  ;;  %v853_v43 = vmul.f32 -0.5, %v1623_v29  ;;  %vm625_vm6 = vcmp.ne.f32.partialorder %v1579_v18, %v1579_v18 }
  0xf3   :  { %v368_v37 = vpop.f32.mrf.mxu1  ;;  %v1104_v38 = vadd.f32 %v984_v31, %v592_v12  ;;  %1288 = vlog2.f32 %v985_v16  ;;  %v1287_v41 = vpop.eup %1286  ;;  %v989_v46 = vadd.f32 1.0, %v988_v27  ;;  %v691_v49 = vand.u32 2147483647, %v1626_v35 }
  0xf4   :  { %1290 = vpow2.f32 %v776_v34  ;;  %v843_v44 = vmul.f32 0.6931472, %v1287_v41  ;;  %v991_v52 = vand.u32 2147483647, %v1283_v21  ;;  %v1639_v53 = vadd.f32 %v1486_v33, %v366_v40 }
  0xf5   :  { %v1136_v48 = vsel %vm624_vm2, %v1561_v51, %v1104_v38  ;;  %1292 = vlog2.f32 %v850_v42  ;;  %v578_v59 = vmax.f32 %v1582_v25, 0.0  ;;  %v854_v57 = vadd.f32 1.0, %v853_v43 }
  0xf6   :  { %1168 = vst [vmem:[#allocation8 + $0xa0] sm:$0xff] %v1136_v48  ;;  %v849_v50 = vsel %vm848_vm5, %v846_v30, %v843_v44  ;;  %1294 = vpow2.f32 %v746_v47  ;;  %v723_v36 = vsub.f32 0.0, %v691_v49  ;;  %v990_v60 = vmul.f32 %v1283_v21, %v989_v46 }
  0xf7   :  { %v1089_v51 = vadd.f32 %v849_v50, %v577_v45  ;;  %vm610_vm7 = vcmp.ne.f32.partialorder %v1582_v25, %v1582_v25  ;;  %v856_v61 = vand.u32 2147483647, %v1623_v29  ;;  %v676_v62 = vand.u32 2147483647, %v1639_v53 }
  0xf8   :  { %v303_v54 = vpop.f32.mrf.mxu2  ;;  %v414_v0 = vadd.f32 %v413_v20, %v300_v15  ;;  %v778_v7 = vmul.f32 1.442695, %v723_v36  ;;  %v369_v8 = vadd.f32 %v368_v37, %v255_v13  ;;  %vm992_vm8 = vcmp.lt.f32.partialorder %v991_v52, 0.0004427343 }
  0xf9   :  { %v416_v55 = vpop.f32.mrf.mxu3  ;;  %v1289_v58 = vpop.eup %1288  ;;  %v1121_v4 = vsel %vm609_vm4, %v1569_v63, %v1089_v51  ;;  %v594_v9 = vmax.f32 %v1596_v56, 0.0  ;;  %v708_v10 = vsub.f32 0.0, %v676_v62  ;;  %v855_v14 = vmul.f32 %v1623_v29, %v854_v57 }
  0xfa   :  { %v1291_v2 = vpop.eup %1290  ;;  %v987_v6 = vmul.f32 0.6931472, %v1289_v58  ;;  %1153 = vst [vmem:[#allocation8 + $0x28] sm:$0xff] %v1121_v4  ;;  %1296 = vpow2.f32 %v778_v7  ;;  %v258_v17 = vpop.f32.mrf.mxu0  ;;  %v1653_v20 = vadd.f32 %v1486_v33, %v414_v0  ;;  %vm857_vm9 = vcmp.lt.f32.partialorder %v856_v61, 0.0004427343 }
  0xfb   :  { %v994_v1 = vadd.f32 1.0, %v1291_v2  ;;  %v1293_v11 = vpop.eup %1292  ;;  %v997_v15 = vmul.f32 -0.5, %v1291_v2  ;;  %v371_v45 = vpop.f32.mrf.mxu1  ;;  %v1656_v23 = vadd.f32 %v1486_v33, %v369_v8  ;;  %v1000_v16 = vand.u32 2147483647, %v1291_v2 }
  0xfc   :  { %v993_v12 = vsel %vm992_vm8, %v990_v60, %v987_v6  ;;  %v1295_v5 = vpop.eup %1294  ;;  %v852_v63 = vmul.f32 0.6931472, %v1293_v11  ;;  %v748_v27 = vmul.f32 1.442695, %v708_v10  ;;  %vm626_vm10 = vcmp.ne.f32.partialorder %v1596_v56, %v1596_v56 }
  0xfd   :  { %v1105_v19 = vadd.f32 %v993_v12, %v593_v39  ;;  %1298 = vlog2.f32 %v994_v1  ;;  %v859_v21 = vadd.f32 1.0, %v1295_v5  ;;  %v862_v22 = vmul.f32 -0.5, %v1295_v5 }
  0xfe   :  { %v858_v26 = vsel %vm857_vm9, %v855_v14, %v852_v63  ;;  %v998_v29 = vadd.f32 1.0, %v997_v15  ;;  %v865_v31 = vand.u32 2147483647, %v1295_v5  ;;  %v579_v32 = vmax.f32 %v1603_v3, 0.0 }
  0xff   :  { %v1137_v24 = vsel %vm625_vm6, %v1579_v18, %v1105_v19  ;;  %v1090_v28 = vadd.f32 %v858_v26, %v578_v59  ;;  %1300 = vlog2.f32 %v859_v21  ;;  %v692_v34 = vand.u32 2147483647, %v1653_v20 }
 0x100   :  { %1169 = vst [vmem:[#allocation8 + $0xa8] sm:$0xff] %v1137_v24  ;;  %1302 = vpow2.f32 %v748_v27  ;;  %v1666_v13 = vpop.f32.mrf.mxu2  ;;  %v1297_v18 = vpop.eup %1296  ;;  %v863_v39 = vadd.f32 1.0, %v862_v22  ;;  %v677_v40 = vand.u32 2147483647, %v1656_v23  ;;  %v417_v41 = vadd.f32 %v416_v55, %v303_v54 }
 0x101   :  { %v1668_v37 = vpop.f32.mrf.mxu3  ;;  %v1122_v38 = vsel %vm610_vm7, %v1582_v25, %v1090_v28  ;;  %vm1675_vm11 = vcmp.lt.f32.partialorder %v1000_v16, 0.0004427343  ;;  %v1003_v43 = vadd.f32 1.0, %v1297_v18  ;;  %v1006_v48 = vmul.f32 -0.5, %v1297_v18 }
 0x102   :  { %1154 = vst [vmem:[#allocation8 + $0x30] sm:$0xff] %v1122_v38  ;;  %v724_v44 = vsub.f32 0.0, %v692_v34  ;;  %v999_v47 = vmul.f32 %v1291_v2, %v998_v29  ;;  %vm1679_vm12 = vcmp.lt.f32.partialorder %v865_v31, 0.0004427343  ;;  %v709_v25 = vsub.f32 0.0, %v677_v40  ;;  %v261_v58 = vpop.f32.mrf.mxu0 }
 0x103   :  { %v1299_v30 = vpop.eup %1298  ;;  %1304 = vlog2.f32 %v1003_v43  ;;  %v1684_v52 = vadd.f32 %v1486_v33, %v417_v41  ;;  %v372_v54 = vadd.f32 %v371_v45, %v258_v17  ;;  %v864_v59 = vmul.f32 %v1295_v5, %v863_v39  ;;  %v374_v60 = vpop.f32.mrf.mxu1 }
 0x104   :  { %v996_v46 = vmul.f32 0.6931472, %v1299_v30  ;;  %v780_v50 = vmul.f32 1.442695, %v724_v44  ;;  %v1009_v57 = vand.u32 2147483647, %v1297_v18  ;;  %vm611_vm13 = vcmp.ne.f32.partialorder %v1603_v3, %v1603_v3 }
 0x105   :  { %v1301_v55 = vpop.eup %1300  ;;  %v750_v36 = vmul.f32 1.442695, %v709_v25  ;;  %v1007_v2 = vadd.f32 1.0, %v1006_v48  ;;  %v693_v10 = vand.u32 2147483647, %v1684_v52  ;;  %v1696_v11 = vadd.f32 %v1486_v33, %v372_v54 }
 0x106   :  { %v1002_v51 = vsel %vm1675_vm11, %v999_v47, %v996_v46  ;;  %v1303_v61 = vpop.eup %1302  ;;  %v861_v0 = vmul.f32 0.6931472, %v1301_v55  ;;  %1306 = vpow2.f32 %v780_v50  ;;  %v595_v14 = vmax.f32 %v1626_v35, 0.0 }
 0x107   :  { %v1106_v62 = vadd.f32 %v1002_v51, %v594_v9  ;;  %v868_v4 = vadd.f32 1.0, %v1303_v61  ;;  %v871_v6 = vmul.f32 -0.5, %v1303_v61  ;;  %v874_v7 = vand.u32 2147483647, %v1303_v61 }
 0x108   :  { %1308 = vpow2.f32 %v750_v36  ;;  %v867_v1 = vsel %vm1679_vm12, %v864_v59, %v861_v0  ;;  %v580_v15 = vmax.f32 %v1639_v53, 0.0  ;;  %v678_v17 = vand.u32 2147483647, %v1696_v11  ;;  %v309_v45 = vpop.f32.mrf.mxu2 }
 0x109   :  { %v1138_v8 = vsel %vm626_vm10, %v1596_v56, %v1106_v62  ;;  %v1091_v9 = vadd.f32 %v867_v1, %v579_v32  ;;  %1310 = vlog2.f32 %v868_v4  ;;  %v1305_v12 = vpop.eup %1304  ;;  %v725_v56 = vsub.f32 0.0, %v693_v10  ;;  %v422_v5 = vpop.f32.mrf.mxu3 }
 0x10a   :  { %1170 = vst [vmem:[#allocation8 + $0xb0] sm:$0xff] %v1138_v8  ;;  %v1005_v63 = vmul.f32 0.6931472, %v1305_v12  ;;  %v1008_v21 = vmul.f32 %v1297_v18, %v1007_v2  ;;  %v872_v22 = vadd.f32 1.0, %v871_v6  ;;  %vm627_vm14 = vcmp.ne.f32.partialorder %v1626_v35, %v1626_v35  ;;  %v264_v42 = vpop.f32.mrf.mxu0 }
 0x10b   :  { %v1123_v19 = vsel %vm611_vm13, %v1603_v3, %v1091_v9  ;;  %vm1010_vm15 = vcmp.lt.f32.partialorder %v1009_v57, 0.0004427343  ;;  %vm1706_vm0 = vcmp.lt.f32.partialorder %v874_v7, 0.0004427343  ;;  %v710_v16 = vsub.f32 0.0, %v678_v17  ;;  %v377_v43 = vpop.f32.mrf.mxu1 }
 0x10c   :  { %v1307_v24 = vpop.eup %1306  ;;  %1155 = vst [vmem:[#allocation8 + $0x38] sm:$0xff] %v1123_v19  ;;  %v1011_v28 = vsel %vm1010_vm15, %v1008_v21, %v1005_v63  ;;  %v782_v31 = vmul.f32 1.442695, %v725_v56  ;;  %v420_v3 = vadd.f32 %v1668_v37, %v1666_v13  ;;  %v375_v38 = vadd.f32 %v374_v60, %v261_v58 }
 0x10d   :  { %v1012_v29 = vadd.f32 1.0, %v1307_v24  ;;  %v1107_v32 = vadd.f32 %v1011_v28, %v595_v14  ;;  %v1015_v34 = vmul.f32 -0.5, %v1307_v24  ;;  %v873_v40 = vmul.f32 %v1303_v61, %v872_v22 }
 0x10e   :  { %v1309_v27 = vpop.eup %1308  ;;  %v752_v30 = vmul.f32 1.442695, %v710_v16  ;;  %v423_v46 = vadd.f32 %v422_v5, %v309_v45  ;;  %v1018_v13 = vand.u32 2147483647, %v1307_v24  ;;  %v1717_v47 = vadd.f32 %v1486_v33, %v420_v3 }
 0x10f   :  { %v877_v18 = vadd.f32 1.0, %v1309_v27  ;;  %v1311_v39 = vpop.eup %1310  ;;  %1312 = vlog2.f32 %v1012_v29  ;;  %v880_v41 = vmul.f32 -0.5, %v1309_v27  ;;  %v1139_v48 = vsel %vm627_vm14, %v1626_v35, %v1107_v32 }
 0x110   :  { %v870_v44 = vmul.f32 0.6931472, %v1311_v39  ;;  %1171 = vst [vmem:[#allocation8 + $0xb8] sm:$0xff] %v1139_v48  ;;  %v883_v37 = vand.u32 2147483647, %v1309_v27  ;;  %v1016_v25 = vadd.f32 1.0, %v1015_v34  ;;  %v1722_v50 = vadd.f32 %v1486_v33, %v375_v38  ;;  %v312_v36 = vpop.f32.mrf.mxu2 }
 0x111   :  { %1314 = vlog2.f32 %v877_v18  ;;  %vm612_vm1 = vcmp.ne.f32.partialorder %v1639_v53, %v1639_v53  ;;  %v881_v54 = vadd.f32 1.0, %v880_v41  ;;  %v694_v55 = vand.u32 2147483647, %v1717_v47  ;;  %v425_v58 = vpop.f32.mrf.mxu3  ;;  %v1766_v39 = vld [vmem:[%s1899_s2] ss:$0 sm:$0xff]  ;;  %s1453_s2 = smov [#allocation8]  }
 0x112   :  { %1316 = vpow2.f32 %v782_v31  ;;  %v876_v49 = vsel %vm1706_vm0, %v873_v40, %v870_v44  ;;  %v596_v51 = vmax.f32 %v1653_v20, 0.0  ;;  %vm628_vm2 = vcmp.ne.f32.partialorder %v1653_v20, %v1653_v20  ;;  %s1184_s28 = sshll.u32 %s1453_s2, 4  ;;  %s1185_s28 = int_to_ptr.vmem [resolvable:$true] %s1184_s28 }
 0x113   :  { %1318 = vpow2.f32 %v752_v30  ;;  %v1092_v35 = vadd.f32 %v876_v49, %v580_v15  ;;  %v679_v59 = vand.u32 2147483647, %v1722_v50  ;;  %v1732_v57 = vadd.f32 %v1486_v33, %v423_v46  ;;  %v380_v26 = vpop.f32.mrf.mxu1 }
 0x114   :  { %vm1735_vm3 = vcmp.lt.f32.partialorder %v1018_v13, 0.0004427343  ;;  %v581_v0 = vmax.f32 %v1656_v23, 0.0  ;;  %v726_v2 = vsub.f32 0.0, %v694_v55  ;;  %v1017_v7 = vmul.f32 %v1307_v24, %v1016_v25  ;;  %v267_v24 = vpop.f32.mrf.mxu0 }
 0x115   :  { %v1313_v60 = vpop.eup %1312  ;;  %v1124_v61 = vsel %vm612_vm1, %v1639_v53, %v1092_v35  ;;  %vm1740_vm4 = vcmp.lt.f32.partialorder %v883_v37, 0.0004427343  ;;  %v378_v1 = vadd.f32 %v377_v43, %v264_v42  ;;  %v882_v12 = vmul.f32 %v1309_v27, %v881_v54 }
 0x116   :  { %1156 = vst [vmem:[#allocation8 + $0x40] sm:$0xff] %v1124_v61  ;;  %v1014_v6 = vmul.f32 0.6931472, %v1313_v60  ;;  %v711_v53 = vsub.f32 0.0, %v679_v59  ;;  %v426_v14 = vadd.f32 %v425_v58, %v312_v36  ;;  %v784_v45 = vmul.f32 1.442695, %v726_v2 }
 0x117   :  { %v1315_v4 = vpop.eup %1314  ;;  %v695_v5 = vand.u32 2147483647, %v1732_v57  ;;  %v1750_v28 = vadd.f32 %v1486_v33, %v378_v1  ;;  %vm613_vm5 = vcmp.ne.f32.partialorder %v1656_v23, %v1656_v23  ;;  %v597_v34 = vmax.f32 %v1684_v52, 0.0 }
 0x118   :  { %v1317_v10 = vpop.eup %1316  ;;  %v879_v9 = vmul.f32 0.6931472, %v1315_v4  ;;  %v1020_v56 = vsel %vm1735_vm3, %v1017_v7, %v1014_v6  ;;  %v754_v32 = vmul.f32 1.442695, %v711_v53  ;;  %vm629_vm6 = vcmp.ne.f32.partialorder %v1684_v52, %v1684_v52  ;;  %v315_v13 = vpop.f32.mrf.mxu2 }
 0x119   :  { %v1319_v15 = vpop.eup %1318  ;;  %v1021_v17 = vadd.f32 1.0, %v1317_v10  ;;  %v1108_v19 = vadd.f32 %v1020_v56, %v596_v51  ;;  %v1024_v21 = vmul.f32 -0.5, %v1317_v10  ;;  %v1027_v3 = vand.u32 2147483647, %v1317_v10  ;;  %v428_v37 = vpop.f32.mrf.mxu3 }
 0x11a   :  { %v885_v63 = vsel %vm1740_vm4, %v882_v12, %v879_v9  ;;  %v886_v22 = vadd.f32 1.0, %v1319_v15  ;;  %v889_v27 = vmul.f32 -0.5, %v1319_v15  ;;  %v727_v18 = vsub.f32 0.0, %v695_v5 }
 0x11b   :  { %v1093_v16 = vadd.f32 %v885_v63, %v581_v0  ;;  %1320 = vlog2.f32 %v1021_v17  ;;  %v1140_v29 = vsel %vm628_vm2, %v1653_v20, %v1108_v19  ;;  %v1025_v33 = vadd.f32 1.0, %v1024_v21  ;;  %v383_v2 = vpop.f32.mrf.mxu1 }
 0x11c   :  { %1322 = vlog2.f32 %v886_v22  ;;  %1172 = vst [vmem:[#allocation8 + $0xc0] sm:$0xff] %v1140_v29  ;;  %v890_v38 = vadd.f32 1.0, %v889_v27  ;;  %v680_v20 = vand.u32 2147483647, %v1750_v28  ;;  %v582_v40 = vmax.f32 %v1696_v11, 0.0  ;;  %v270_v0 = vpop.f32.mrf.mxu0 }
 0x11d   :  { %v1125_v31 = vsel %vm613_vm5, %v1656_v23, %v1093_v16  ;;  %1324 = vpow2.f32 %v784_v45  ;;  %v1769_v23 = vadd.f32 %v1766_v39, %v426_v14  ;;  %vm614_vm7 = vcmp.ne.f32.partialorder %v1696_v11, %v1696_v11 }
 0x11e   :  { %1157 = vst [vmem:[#allocation8 + $0x48] sm:$0xff] %v1125_v31  ;;  %1326 = vpow2.f32 %v754_v32  ;;  %v892_v41 = vand.u32 2147483647, %v1319_v15  ;;  %v786_v30 = vmul.f32 1.442695, %v727_v18  ;;  %v598_v48 = vmax.f32 %v1717_v47, 0.0 }
 0x11f   :  { %vm1774_vm8 = vcmp.lt.f32.partialorder %v1027_v3, 0.0004427343  ;;  %v712_v44 = vsub.f32 0.0, %v680_v20  ;;  %v696_v46 = vand.u32 2147483647, %v1769_v23  ;;  %v1026_v35 = vmul.f32 %v1317_v10, %v1025_v33 }
 0x120   :  { %1328 = vpow2.f32 %v786_v30  ;;  %v381_v54 = vadd.f32 %v380_v26, %v267_v24  ;;  %v891_v59 = vmul.f32 %v1319_v15, %v890_v38  ;;  %vm893_vm9 = vcmp.lt.f32.partialorder %v892_v41, 0.0004427343  ;;  %v318_v31 = vpop.f32.mrf.mxu2 }
 0x121   :  { %v1321_v42 = vpop.eup %1320  ;;  %v756_v36 = vmul.f32 1.442695, %v712_v44  ;;  %v728_v58 = vsub.f32 0.0, %v696_v46  ;;  %v429_v9 = vadd.f32 %v428_v37, %v315_v13  ;;  %v384_v15 = vadd.f32 %v383_v2, %v270_v0  ;;  %v431_v3 = vpop.f32.mrf.mxu3 }
 0x122   :  { %v1323_v49 = vpop.eup %1322  ;;  %v1023_v25 = vmul.f32 0.6931472, %v1321_v42  ;;  %v1783_v10 = vadd.f32 %v1766_v39, %v381_v54  ;;  %v583_v5 = vmax.f32 %v1722_v50, 0.0  ;;  %vm630_vm10 = vcmp.ne.f32.partialorder %v1717_v47, %v1717_v47 }
 0x123   :  { %v1325_v55 = vpop.eup %1324  ;;  %v888_v51 = vmul.f32 0.6931472, %v1323_v49  ;;  %1330 = vpow2.f32 %v756_v36  ;;  %v788_v8 = vmul.f32 1.442695, %v728_v58  ;;  %v1799_v26 = vadd.f32 %v1766_v39, %v429_v9 }
 0x124   :  { %v1029_v60 = vsel %vm1774_vm8, %v1026_v35, %v1023_v25  ;;  %v1030_v61 = vadd.f32 1.0, %v1325_v55  ;;  %v1033_v62 = vmul.f32 -0.5, %v1325_v55  ;;  %v1327_v4 = vpop.eup %1326  ;;  %v1036_v45 = vand.u32 2147483647, %v1325_v55 }
 0x125   :  { %v1109_v6 = vadd.f32 %v1029_v60, %v597_v34  ;;  %v894_v7 = vsel %vm893_vm9, %v891_v59, %v888_v51  ;;  %v895_v53 = vadd.f32 1.0, %v1327_v4  ;;  %v898_v14 = vmul.f32 -0.5, %v1327_v4 }
 0x126   :  { %v1094_v1 = vadd.f32 %v894_v7, %v582_v40  ;;  %1332 = vlog2.f32 %v1030_v61  ;;  %v1329_v56 = vpop.eup %1328  ;;  %v1034_v19 = vadd.f32 1.0, %v1033_v62  ;;  %v901_v21 = vand.u32 2147483647, %v1327_v4 }
 0x127   :  { %v1141_v12 = vsel %vm629_vm6, %v1684_v52, %v1109_v6  ;;  %1334 = vpow2.f32 %v788_v8  ;;  %v599_v52 = vmax.f32 %v1732_v57, 0.0  ;;  %v1039_v63 = vadd.f32 1.0, %v1329_v56  ;;  %v273_v8 = vpop.f32.mrf.mxu0 }
 0x128   :  { %1173 = vst [vmem:[#allocation8 + $0xc8] sm:$0xff] %v1141_v12  ;;  %v1126_v17 = vsel %vm614_vm7, %v1696_v11, %v1094_v1  ;;  %1336 = vlog2.f32 %v895_v53  ;;  %v1042_v22 = vmul.f32 -0.5, %v1329_v56  ;;  %v681_v24 = vand.u32 2147483647, %v1783_v10  ;;  %v386_v1 = vpop.f32.mrf.mxu1 }
 0x129   :  { %1158 = vst [vmem:[#allocation8 + $0x50] sm:$0xff] %v1126_v17  ;;  %v1331_v11 = vpop.eup %1330  ;;  %v899_v16 = vadd.f32 1.0, %v898_v14  ;;  %1338 = vlog2.f32 %v1039_v63  ;;  %v584_v27 = vmax.f32 %v1750_v28, 0.0  ;;  %v1803_v29 = vadd.f32 %v1766_v39, %v384_v15 }
 0x12a   :  { %vm1805_vm11 = vcmp.lt.f32.partialorder %v1036_v45, 0.0004427343  ;;  %vm615_vm12 = vcmp.ne.f32.partialorder %v1722_v50, %v1722_v50  ;;  %v1045_v33 = vand.u32 2147483647, %v1329_v56  ;;  %v904_v18 = vadd.f32 1.0, %v1331_v11  ;;  %v321_v45 = vpop.f32.mrf.mxu2 }
 0x12b   :  { %v907_v38 = vmul.f32 -0.5, %v1331_v11  ;;  %v1035_v40 = vmul.f32 %v1325_v55, %v1034_v19  ;;  %v1043_v41 = vadd.f32 1.0, %v1042_v22  ;;  %v713_v30 = vsub.f32 0.0, %v681_v24 }
 0x12c   :  { %v1333_v32 = vpop.eup %1332  ;;  %vm1811_vm13 = vcmp.lt.f32.partialorder %v901_v21, 0.0004427343  ;;  %vm631_vm14 = vcmp.ne.f32.partialorder %v1732_v57, %v1732_v57  ;;  %1340 = vlog2.f32 %v904_v18  ;;  %v697_v46 = vand.u32 2147483647, %v1799_v26 }
 0x12d   :  { %v1032_v20 = vmul.f32 0.6931472, %v1333_v32  ;;  %v1335_v42 = vpop.eup %1334  ;;  %v908_v44 = vadd.f32 1.0, %v907_v38  ;;  %v900_v49 = vmul.f32 %v1327_v4, %v899_v16  ;;  %vm1822_vm15 = vcmp.lt.f32.partialorder %v1045_v33, 0.0004427343 }
 0x12e   :  { %v1337_v13 = vpop.eup %1336  ;;  %v1048_v25 = vadd.f32 1.0, %v1335_v42  ;;  %v1051_v35 = vmul.f32 -0.5, %v1335_v42  ;;  %v910_v59 = vand.u32 2147483647, %v1331_v11  ;;  %v1044_v58 = vmul.f32 %v1329_v56, %v1043_v41 }
 0x12f   :  { %v1038_v37 = vsel %vm1805_vm11, %v1035_v40, %v1032_v20  ;;  %v897_v55 = vmul.f32 0.6931472, %v1337_v13  ;;  %v1339_v36 = vpop.eup %1338  ;;  %v758_v60 = vmul.f32 1.442695, %v713_v30  ;;  %v729_v61 = vsub.f32 0.0, %v697_v46 }
 0x130   :  { %v1110_v54 = vadd.f32 %v1038_v37, %v598_v48  ;;  %1342 = vlog2.f32 %v1048_v25  ;;  %v1041_v48 = vmul.f32 0.6931472, %v1339_v36  ;;  %v909_v2 = vmul.f32 %v1331_v11, %v908_v44 }
 0x131   :  { %v903_v0 = vsel %vm1811_vm13, %v900_v49, %v897_v55  ;;  %v1052_v6 = vadd.f32 1.0, %v1051_v35  ;;  %1344 = vpow2.f32 %v758_v60  ;;  %v790_v7 = vmul.f32 1.442695, %v729_v61 }
 0x132   :  { %v1142_v62 = vsel %vm630_vm10, %v1717_v47, %v1110_v54  ;;  %v1095_v4 = vadd.f32 %v903_v0, %v583_v5  ;;  %v1341_v9 = vpop.eup %1340  ;;  %v1047_v12 = vsel %vm1822_vm15, %v1044_v58, %v1041_v48  ;;  %v1054_v53 = vand.u32 2147483647, %v1335_v42  ;;  %v434_v5 = vpop.f32.mrf.mxu3 }
 0x133   :  { %1174 = vst [vmem:[#allocation8 + $0xd0] sm:$0xff] %v1142_v62  ;;  %v682_v14 = vand.u32 2147483647, %v1803_v29  ;;  %v432_v47 = vadd.f32 %v431_v3, %v318_v31  ;;  %v1111_v56 = vadd.f32 %v1047_v12, %v599_v52  ;;  %v906_v17 = vmul.f32 0.6931472, %v1341_v9 }
 0x134   :  { %v1127_v15 = vsel %vm615_vm12, %v1722_v50, %v1095_v4  ;;  %1346 = vpow2.f32 %v790_v7  ;;  %vm911_vm0 = vcmp.lt.f32.partialorder %v910_v59, 0.0004427343  ;;  %v387_v21 = vadd.f32 %v386_v1, %v273_v8 }
 0x135   :  { %1159 = vst [vmem:[#allocation8 + $0x58] sm:$0xff] %v1127_v15  ;;  %v714_v19 = vsub.f32 0.0, %v682_v14  ;;  %v1840_v63 = vadd.f32 %v1766_v39, %v432_v47  ;;  %v1143_v24 = vsel %vm631_vm14, %v1732_v57, %v1111_v56  ;;  %v912_v11 = vsel %vm911_vm0, %v909_v2, %v906_v17 }
 0x136   :  { %v1343_v22 = vpop.eup %1342  ;;  %v1053_v50 = vmul.f32 %v1335_v42, %v1052_v6  ;;  %1175 = vst [vmem:[#allocation8 + $0xd8] sm:$0xff] %v1143_v24  ;;  %v1096_v52 = vadd.f32 %v912_v11, %v584_v27  ;;  %v435_v3 = vadd.f32 %v434_v5, %v321_v45  ;;  %vm616_vm1 = vcmp.ne.f32.partialorder %v1750_v28, %v1750_v28 }
 0x137   :  { %v1050_v16 = vmul.f32 0.6931472, %v1343_v22  ;;  %v760_v31 = vmul.f32 1.442695, %v714_v19  ;;  %v1345_v32 = vpop.eup %1344  ;;  %v600_v34 = vmax.f32 %v1769_v23, 0.0  ;;  %v1854_v20 = vadd.f32 %v1766_v39, %v387_v21 }
 0x138   :  { %vm1055_vm2 = vcmp.lt.f32.partialorder %v1054_v53, 0.0004427343  ;;  %v698_v33 = vand.u32 2147483647, %v1840_v63  ;;  %v1128_v57 = vsel %vm616_vm1, %v1750_v28, %v1096_v52  ;;  %v913_v38 = vadd.f32 1.0, %v1345_v32 }
 0x139   :  { %v1056_v18 = vsel %vm1055_vm2, %v1053_v50, %v1050_v16  ;;  %1160 = vst [vmem:[#allocation8 + $0x60] sm:$0xff] %v1128_v57  ;;  %v916_v41 = vmul.f32 -0.5, %v1345_v32  ;;  %1348 = vpow2.f32 %v760_v31  ;;  %vm632_vm3 = vcmp.ne.f32.partialorder %v1769_v23, %v1769_v23 }
 0x13a   :  { %v1347_v27 = vpop.eup %1346  ;;  %v1112_v40 = vadd.f32 %v1056_v18, %v600_v34  ;;  %v730_v30 = vsub.f32 0.0, %v698_v33  ;;  %1350 = vlog2.f32 %v913_v38  ;;  %v1859_v43 = vadd.f32 %v1766_v39, %v435_v3 }
 0x13b   :  { %v1057_v42 = vadd.f32 1.0, %v1347_v27  ;;  %v1060_v44 = vmul.f32 -0.5, %v1347_v27  ;;  %v917_v13 = vadd.f32 1.0, %v916_v41  ;;  %v683_v37 = vand.u32 2147483647, %v1854_v20 }
 0x13c   :  { %v1144_v28 = vsel %vm632_vm3, %v1769_v23, %v1112_v40  ;;  %v792_v46 = vmul.f32 1.442695, %v730_v30  ;;  %v919_v49 = vand.u32 2147483647, %v1345_v32  ;;  %v699_v25 = vand.u32 2147483647, %v1859_v43 }
 0x13d   :  { %1176 = vst [vmem:[#allocation8 + $0xe0] sm:$0xff] %v1144_v28  ;;  %1352 = vlog2.f32 %v1057_v42  ;;  %v1061_v54 = vadd.f32 1.0, %v1060_v44  ;;  %v715_v55 = vsub.f32 0.0, %v683_v37  ;;  %v585_v39 = vmax.f32 %v1783_v10, 0.0 }
 0x13e   :  { %1354 = vpow2.f32 %v792_v46  ;;  %v1063_v59 = vand.u32 2147483647, %v1347_v27  ;;  %v731_v23 = vsub.f32 0.0, %v699_v25  ;;  %v918_v60 = vmul.f32 %v1345_v32, %v917_v13 }
 0x13f   :  { %v1349_v35 = vpop.eup %1348  ;;  %v762_v62 = vmul.f32 1.442695, %v715_v55  ;;  %vm617_vm4 = vcmp.ne.f32.partialorder %v1783_v10, %v1783_v10  ;;  %vm920_vm5 = vcmp.lt.f32.partialorder %v919_v49, 0.0004427343  ;;  %v1062_v7 = vmul.f32 %v1347_v27, %v1061_v54 }
 0x140   :  { %v1351_v51 = vpop.eup %1350  ;;  %v922_v36 = vadd.f32 1.0, %v1349_v35  ;;  %v925_v61 = vmul.f32 -0.5, %v1349_v35  ;;  %v794_v48 = vmul.f32 1.442695, %v731_v23  ;;  %v601_v1 = vmax.f32 %v1799_v26, 0.0 }
 0x141   :  { %v915_v58 = vmul.f32 0.6931472, %v1351_v51  ;;  %vm1064_vm6 = vcmp.lt.f32.partialorder %v1063_v59, 0.0004427343  ;;  %v928_v56 = vand.u32 2147483647, %v1349_v35  ;;  %vm633_vm7 = vcmp.ne.f32.partialorder %v1799_v26, %v1799_v26 }
 0x142   :  { %1356 = vlog2.f32 %v922_v36  ;;  %v926_v53 = vadd.f32 1.0, %v925_v61  ;;  %v586_v24 = vmax.f32 %v1803_v29, 0.0  ;;  %vm618_vm9 = vcmp.ne.f32.partialorder %v1803_v29, %v1803_v29 }
 0x143   :  { %v1353_v0 = vpop.eup %1352  ;;  %v921_v4 = vsel %vm920_vm5, %v918_v60, %v915_v58  ;;  %1358 = vpow2.f32 %v762_v62  ;;  %vm929_vm8 = vcmp.lt.f32.partialorder %v928_v56, 0.0004427343  ;;  %v602_v57 = vmax.f32 %v1840_v63, 0.0 }
 0x144   :  { %v1355_v2 = vpop.eup %1354  ;;  %v1059_v6 = vmul.f32 0.6931472, %v1353_v0  ;;  %v1097_v8 = vadd.f32 %v921_v4, %v585_v39  ;;  %1360 = vpow2.f32 %v794_v48  ;;  %v927_v21 = vmul.f32 %v1349_v35, %v926_v53 }
 0x145   :  { %v1066_v9 = vadd.f32 1.0, %v1355_v2  ;;  %v1069_v14 = vmul.f32 -0.5, %v1355_v2  ;;  %v1072_v11 = vand.u32 2147483647, %v1355_v2  ;;  %vm634_vm11 = vcmp.ne.f32.partialorder %v1840_v63, %v1840_v63 }
 0x146   :  { %v1065_v12 = vsel %vm1064_vm6, %v1062_v7, %v1059_v6  ;;  %v1129_v47 = vsel %vm617_vm4, %v1783_v10, %v1097_v8  ;;  %v587_v13 = vmax.f32 %v1854_v20, 0.0  ;;  %vm619_vm13 = vcmp.ne.f32.partialorder %v1854_v20, %v1854_v20 }
 0x147   :  { %v1113_v15 = vadd.f32 %v1065_v12, %v601_v1  ;;  %1362 = vlog2.f32 %v1066_v9  ;;  %1161 = vst [vmem:[#allocation8 + $0x68] sm:$0xff] %v1129_v47  ;;  %v1070_v22 = vadd.f32 1.0, %v1069_v14  ;;  %vm1073_vm10 = vcmp.lt.f32.partialorder %v1072_v11, 0.0004427343 }
 0x148   :  { %v1357_v17 = vpop.eup %1356  ;;  %v603_v55 = vmax.f32 %v1859_v43, 0.0  ;;  %vm635_vm15 = vcmp.ne.f32.partialorder %v1859_v43, %v1859_v43 }
 0x149   :  { %v1145_v45 = vsel %vm633_vm7, %v1799_v26, %v1113_v15  ;;  %v1359_v5 = vpop.eup %1358  ;;  %v924_v19 = vmul.f32 0.6931472, %v1357_v17  ;;  %v1071_v32 = vmul.f32 %v1355_v2, %v1070_v22 }
 0x14a   :  { %1177 = vst [vmem:[#allocation8 + $0xe8] sm:$0xff] %v1145_v45  ;;  %v931_v10 = vadd.f32 1.0, %v1359_v5  ;;  %v1361_v50 = vpop.eup %1360  ;;  %v934_v16 = vmul.f32 -0.5, %v1359_v5  ;;  %v937_v41 = vand.u32 2147483647, %v1359_v5 }
 0x14b   :  { %v930_v52 = vsel %vm929_vm8, %v927_v21, %v924_v19  ;;  %v1075_v34 = vadd.f32 1.0, %v1361_v50  ;;  %v1078_v18 = vmul.f32 -0.5, %v1361_v50  ;;  %v1081_v46 = vand.u32 2147483647, %v1361_v50 }
 0x14c   :  { %v1098_v3 = vadd.f32 %v930_v52, %v586_v24  ;;  %1364 = vlog2.f32 %v931_v10  ;;  %v935_v27 = vadd.f32 1.0, %v934_v16  ;;  %vm938_vm12 = vcmp.lt.f32.partialorder %v937_v41, 0.0004427343 }
 0x14d   :  { %v1363_v31 = vpop.eup %1362  ;;  %1366 = vlog2.f32 %v1075_v34  ;;  %v1079_v28 = vadd.f32 1.0, %v1078_v18  ;;  %vm1082_vm14 = vcmp.lt.f32.partialorder %v1081_v46, 0.0004427343 }
 0x14e   :  { %v1068_v26 = vmul.f32 0.6931472, %v1363_v31  ;;  %v1130_v33 = vsel %vm618_vm9, %v1803_v29, %v1098_v3  ;;  %v936_v29 = vmul.f32 %v1359_v5, %v935_v27 }
 0x14f   :  { %1162 = vst [vmem:[#allocation8 + $0x70] sm:$0xff] %v1130_v33  ;;  %v1080_v54 = vmul.f32 %v1361_v50, %v1079_v28 }
 0x150   :  { %v1074_v38 = vsel %vm1073_vm10, %v1071_v32, %v1068_v26 }
 0x151   :  { %v1114_v40 = vadd.f32 %v1074_v38, %v602_v57 }
 0x152   :  { %v1365_v30 = vpop.eup %1364 }
 0x153   :  { %v1146_v42 = vsel %vm634_vm11, %v1840_v63, %v1114_v40  ;;  %v933_v44 = vmul.f32 0.6931472, %v1365_v30  ;;  %v1367_v37 = vpop.eup %1366 }
 0x154   :  { %1178 = vst [vmem:[#allocation8 + $0xf0] sm:$0xff] %v1146_v42  ;;  %v1077_v35 = vmul.f32 0.6931472, %v1367_v37 }
 0x155   :  { %v939_v49 = vsel %vm938_vm12, %v936_v29, %v933_v44 }
 0x156   :  { %v1099_v25 = vadd.f32 %v939_v49, %v587_v13  ;;  %v1083_v51 = vsel %vm1082_vm14, %v1080_v54, %v1077_v35 }
 0x157   :  { %v1115_v39 = vadd.f32 %v1083_v51, %v603_v55 }
 0x158   :  { %v1131_v63 = vsel %vm619_vm13, %v1854_v20, %v1099_v25 }
 0x159   :  { %1163 = vst [vmem:[#allocation8 + $0x78] sm:$0xff] %v1131_v63  ;;  %v1147_v59 = vsel %vm635_vm15, %v1859_v43, %v1115_v39 }
 0x15a   :  { %1179 = vst [vmem:[#allocation8 + $0xf8] sm:$0xff] %v1147_v59 }
 0x15b   :  { %1192 = dma.vmem_to_hbm [thread:$0]  %s1185_s28, 4096, %s1187_s4, [#allocation5], %s1448_s20, %s1448_s20, %s1449_s21  }
 0x15c   :  { %1445 = dma.done.wait [#allocation5], 4096  }
 0x15d   :  { %1446 = vsyncadd [#allocation5], 4294963200 }
 0x15e   :  { %1197 = vsyncpa [#allocation4], 1 }
 0x15f   :  { %1198 = vsyncpa [#allocation7], 1 }
 0x160   :  { %1199 = vsyncpa [#allocation5], 1 }

</bundles_post_ra>
